<compile_context>
chip_gen: v5e
topology: v5e:2x2
jax: 0.10.0
libtpu: 0.0.40
codegen_flags: <defaults>
</compile_context>

<pallas_src>
import functools

import jax
import jax.numpy as jnp
from jax.experimental import pallas as pl
from jax.experimental.pallas import tpu as pltpu


# --------------------------------------------------------------------------
# Fused kernel factory: (x_tm, [wx, wh, b] * L, w_out, b_out) -> (B, O)
# scratch: seq_sc (T, B, H) matmul_dtype — inter-layer hidden sequence in VMEM
# --------------------------------------------------------------------------
def _make_fused_lstm_kernel(num_layers, B, T, F, H, O, matmul_dtype):
    def kernel(*refs):
        x_ref = refs[0]
        layer_refs = []
        ri = 1
        for _ in range(num_layers):
            layer_refs.append((refs[ri], refs[ri + 1], refs[ri + 2]))
            ri += 3
        w_out_ref, b_out_ref = refs[ri], refs[ri + 1]
        out_ref = refs[ri + 2]
        seq_sc = refs[ri + 3]                      # (T, B, H) matmul_dtype

        # ---- hoisted, loop-invariant lane constants (JAX won't CSE broadcasts) ----
        # sigmoid(x) = 0.5*tanh(0.5*x) + 0.5  ->  fold the 4 gate nonlinearities
        # into ONE full-width tanh: scale i/f/o lane ranges by 0.5, g lanes by 1.0.
        lane = jax.lax.broadcasted_iota(jnp.int32, (B, 4 * H), 1)
        gate_scale = jnp.where((lane >= 2 * H) & (lane < 3 * H),
                               jnp.float32(1.0), jnp.float32(0.5))

        # Current layer input, time-major, flattened once per layer to (T*B, feat)
        # for the hoisted MXU projection (row index = t*B + b).
        cur = x_ref[...].astype(matmul_dtype).reshape(T * B, F)

        h = None
        for layer, (wx_ref, wh_ref, b_ref) in enumerate(layer_refs):
            wx = wx_ref[...]                       # (I, 4H)  matmul_dtype
            wh = wh_ref[...]                       # (H, 4H)  matmul_dtype
            b = b_ref[...]                         # (1, 4H)  f32

            # Hoisted (non-recurrent) input projection for ALL timesteps at once.
            gx = jnp.dot(cur, wx, preferred_element_type=jnp.float32) + b
            gx = gx.reshape(T, B, 4 * H)           # time-major: gx[t] is addr math

            h = jnp.zeros((B, H), jnp.float32)
            c = jnp.zeros((B, H), jnp.float32)
            last = layer == num_layers - 1

            # Serial recurrence, statically unrolled (fine at toy T; see TODOs).
            for t in range(T):
                gates = gx[t] + jnp.dot(h.astype(wh.dtype), wh,
                                        preferred_element_type=jnp.float32)
                tg = jnp.tanh(gates * gate_scale)   # single full-width EUP op
                i_g = 0.5 * tg[:, 0 * H:1 * H] + 0.5
                f_g = 0.5 * tg[:, 1 * H:2 * H] + 0.5
                g_g = tg[:, 2 * H:3 * H]
                o_g = 0.5 * tg[:, 3 * H:4 * H] + 0.5
                c = f_g * c + i_g * g_g
                h = o_g * jnp.tanh(c)
                if not last:
                    # Leading-dim store; every t is written before the next layer
                    # reads, so uninitialized scratch is never observed.
                    seq_sc[t] = h.astype(matmul_dtype)

            if not last:
                cur = seq_sc[...].reshape(T * B, H)   # once per layer, not per step

        # Final Linear on the top layer's last-timestep hidden state.
        w_out = w_out_ref[...]
        out = jnp.dot(h.astype(w_out.dtype), w_out,
                      preferred_element_type=jnp.float32) + b_out_ref[...]
        out_ref[...] = out.astype(out_ref.dtype)

    return kernel


# --------------------------------------------------------------------------
# Full forward:  x (B, T, F) -> (B, output_size)   (one pallas_call)
# --------------------------------------------------------------------------
@functools.partial(jax.jit, static_argnames=("num_layers", "matmul_dtype"))
def lstm_forward(x, params, num_layers, matmul_dtype=jnp.bfloat16):
    B, T, F = x.shape
    H = params["wh_0"].shape[0]
    O = params["w_out"].shape[1]

    # Fail loudly on shapes that would force slow in-kernel relayouts.
    assert T % 8 == 0, "seq_len must be a multiple of 8 (sublane tiling)"
    assert (4 * H) % 128 == 0, "4*hidden_size must be a multiple of 128 (lane tiling)"

    # Time-major layout (free layout plumbing in the XLA wrapper).
    x_tm = jnp.transpose(x, (1, 0, 2))             # (T, B, F)

    args = [x_tm]
    for layer in range(num_layers):
        args += [
            params[f"wx_{layer}"].astype(matmul_dtype),
            params[f"wh_{layer}"].astype(matmul_dtype),
            params[f"b_{layer}"],                  # bias kept f32
        ]
    args += [params["w_out"].astype(matmul_dtype), params["b_out"]]

    kernel = _make_fused_lstm_kernel(num_layers, B, T, F, H, O, matmul_dtype)
    return pl.pallas_call(
        kernel,
        out_shape=jax.ShapeDtypeStruct((B, O), jnp.float32),
        # Inter-layer sequence lives in VMEM in the matmul dtype (bf16 by default).
        scratch_shapes=[pltpu.VMEM((T, B, H), matmul_dtype)],
    )(*args)


# --------------------------------------------------------------------------
# Pure-JAX reference (same math; matmul_dtype lets us mirror the bf16 policy)
# --------------------------------------------------------------------------
def lstm_forward_ref(x, params, num_layers, hidden_size, matmul_dtype=jnp.float32):
    B, T, _ = x.shape
    seq = x
    for layer in range(num_layers):
        wx = params[f"wx_{layer}"].astype(matmul_dtype)
        wh = params[f"wh_{layer}"].astype(matmul_dtype)
        b = params[f"b_{layer}"]
        h = jnp.zeros((B, hidden_size), jnp.float32)
        c = jnp.zeros((B, hidden_size), jnp.float32)
        outs = []
        for t in range(T):
            gates = (jnp.dot(seq[:, t, :].astype(matmul_dtype), wx,
                             preferred_element_type=jnp.float32)
                     + jnp.dot(h.astype(matmul_dtype), wh,
                               preferred_element_type=jnp.float32)
                     + b)
            i_g = jax.nn.sigmoid(gates[:, 0 * hidden_size:1 * hidden_size])
            f_g = jax.nn.sigmoid(gates[:, 1 * hidden_size:2 * hidden_size])
            g_g = jnp.tanh(gates[:, 2 * hidden_size:3 * hidden_size])
            o_g = jax.nn.sigmoid(gates[:, 3 * hidden_size:4 * hidden_size])
            c = f_g * c + i_g * g_g
            h = o_g * jnp.tanh(c)
            outs.append(h)
        seq = jnp.stack(outs, axis=1)
    w_out = params["w_out"].astype(matmul_dtype)
    return (jnp.dot(seq[:, -1, :].astype(matmul_dtype), w_out,
                    preferred_element_type=jnp.float32) + params["b_out"])


# --------------------------------------------------------------------------
# Deterministic parameter init (PyTorch-style uniform(-1/sqrt(H), 1/sqrt(H)))
# --------------------------------------------------------------------------
def init_params(key, input_size, hidden_size, num_layers, output_size):
    params = {}
    bound = 1.0 / jnp.sqrt(hidden_size)
    for layer in range(num_layers):
        in_dim = input_size if layer == 0 else hidden_size
        key, k1, k2, k3, k4 = jax.random.split(key, 5)
        # stored already transposed for x @ W layout, PyTorch gate order i,f,g,o
        params[f"wx_{layer}"] = jax.random.uniform(
            k1, (in_dim, 4 * hidden_size), jnp.float32, -bound, bound)
        params[f"wh_{layer}"] = jax.random.uniform(
            k2, (hidden_size, 4 * hidden_size), jnp.float32, -bound, bound)
        b_ih = jax.random.uniform(k3, (4 * hidden_size,), jnp.float32, -bound, bound)
        b_hh = jax.random.uniform(k4, (4 * hidden_size,), jnp.float32, -bound, bound)
        params[f"b_{layer}"] = (b_ih + b_hh).reshape(1, 4 * hidden_size)
    key, k5, k6 = jax.random.split(key, 3)
    params["w_out"] = jax.random.uniform(
        k5, (hidden_size, output_size), jnp.float32, -bound, bound)
    params["b_out"] = jax.random.uniform(
        k6, (1, output_size), jnp.float32, -bound, bound)
    return params


if __name__ == "__main__":
    # Small shapes consistent with the module's forward (seq_len multiple of 8
    # keeps in-kernel reshapes tile-aligned; 4*hidden = 128 lanes).
    batch, seq_len, input_size = 2, 8, 4
    hidden_size, num_rnn_layers, output_size = 32, 2, 4

    key = jax.random.PRNGKey(0)
    key, xk = jax.random.split(key)
    x = jax.random.normal(xk, (batch, seq_len, input_size), jnp.float32)
    params = init_params(key, input_size, hidden_size, num_rnn_layers, output_size)

    out = lstm_forward(x, params, num_rnn_layers)
    out = jax.block_until_ready(out)
    assert out.shape == (batch, output_size)

    # Tight check vs a reference using the SAME bf16-matmul / f32-accum policy.
    ref_matched = lstm_forward_ref(x, params, num_rnn_layers, hidden_size,
                                   matmul_dtype=jnp.bfloat16)
    assert jnp.allclose(out, ref_matched, atol=5e-3, rtol=5e-3), \
        "mismatch vs matched-dtype JAX reference"

    # Loose check vs the full-f32 (PyTorch-semantics) reference: only bf16
    # quantization error is expected here.
    ref_f32 = lstm_forward_ref(x, params, num_rnn_layers, hidden_size,
                               matmul_dtype=jnp.float32)
    assert jnp.allclose(out, ref_f32, atol=5e-2, rtol=5e-2), \
        "mismatch vs f32 JAX reference"

    print("KERNEL_OK")
</pallas_src>

<mosaic_0001>
module attributes {stable_mosaic.version = 11 : i64} {
  func.func @kernel(%arg0: memref<8x2x4xf32, #tpu.memory_space<vmem>>, %arg1: memref<4x128xbf16, #tpu.memory_space<vmem>>, %arg2: memref<32x128xbf16, #tpu.memory_space<vmem>>, %arg3: memref<1x128xf32, #tpu.memory_space<vmem>>, %arg4: memref<32x128xbf16, #tpu.memory_space<vmem>>, %arg5: memref<32x128xbf16, #tpu.memory_space<vmem>>, %arg6: memref<1x128xf32, #tpu.memory_space<vmem>>, %arg7: memref<32x4xbf16, #tpu.memory_space<vmem>>, %arg8: memref<1x4xf32, #tpu.memory_space<vmem>>, %arg9: memref<2x4xf32, #tpu.memory_space<vmem>>, %arg10: memref<8x2x32xbf16, #tpu.memory_space<vmem>>) attributes {dimension_semantics = [], scalar_prefetch = 0 : i64, scratch_operands = 1 : i64, tpu.core_type = #tpu.core_type<tc>} {
    %0 = tpu.iota {dimensions = array<i32: 1>} : vector<2x128xi32>
    %c64_i32 = arith.constant 64 : i32
    %1 = vector.broadcast %c64_i32 : i32 to vector<2x128xi32>
    %2 = arith.cmpi sge, %0, %1 : vector<2x128xi32>
    %c96_i32 = arith.constant 96 : i32
    %3 = vector.broadcast %c96_i32 : i32 to vector<2x128xi32>
    %4 = arith.cmpi slt, %0, %3 : vector<2x128xi32>
    %5 = arith.andi %2, %4 : vector<2x128xi1>
    %cst = arith.constant 1.000000e+00 : f32
    %cst_0 = arith.constant 5.000000e-01 : f32
    %6 = vector.broadcast %cst : f32 to vector<2x128xf32>
    %7 = vector.broadcast %cst_0 : f32 to vector<2x128xf32>
    %8 = arith.select %5, %6, %7 : vector<2x128xi1>, vector<2x128xf32>
    %c0 = arith.constant 0 : index
    %c0_1 = arith.constant 0 : index
    %c0_2 = arith.constant 0 : index
    %9 = vector.load %arg0[%c0, %c0_1, %c0_2] : memref<8x2x4xf32, #tpu.memory_space<vmem>>, vector<8x2x4xf32>
    %10 = arith.truncf %9 : vector<8x2x4xf32> to vector<8x2x4xbf16>
    %11 = vector.shape_cast %10 : vector<8x2x4xbf16> to vector<16x4xbf16>
    %c0_3 = arith.constant 0 : index
    %c0_4 = arith.constant 0 : index
    %12 = vector.load %arg1[%c0_3, %c0_4] : memref<4x128xbf16, #tpu.memory_space<vmem>>, vector<4x128xbf16>
    %c0_5 = arith.constant 0 : index
    %c0_6 = arith.constant 0 : index
    %13 = vector.load %arg2[%c0_5, %c0_6] : memref<32x128xbf16, #tpu.memory_space<vmem>>, vector<32x128xbf16>
    %c0_7 = arith.constant 0 : index
    %c0_8 = arith.constant 0 : index
    %14 = vector.load %arg3[%c0_7, %c0_8] : memref<1x128xf32, #tpu.memory_space<vmem>>, vector<1x128xf32>
    %cst_9 = arith.constant dense<0.000000e+00> : vector<16x128xf32>
    %15 = tpu.matmul %11, %12, %cst_9 {dimension_numbers = #tpu.dot_dimension_numbers<[1], [0], [0], [1], [0, 0, 1, 1], [], []>} : vector<16x4xbf16>, vector<4x128xbf16>, vector<16x128xf32> -> vector<16x128xf32>
    %16 = vector.broadcast %14 : vector<1x128xf32> to vector<16x128xf32>
    %17 = arith.addf %15, %16 : vector<16x128xf32>
    %18 = vector.shape_cast %17 : vector<16x128xf32> to vector<8x2x128xf32>
    %cst_10 = arith.constant 0.000000e+00 : f32
    %19 = vector.broadcast %cst_10 : f32 to vector<2x32xf32>
    %cst_11 = arith.constant 0.000000e+00 : f32
    %20 = vector.broadcast %cst_11 : f32 to vector<2x32xf32>
    %21 = vector.extract_strided_slice %18 {offsets = [0, 0, 0], sizes = [1, 2, 128], strides = [1, 1, 1]} : vector<8x2x128xf32> to vector<1x2x128xf32>
    %22 = vector.shape_cast %21 : vector<1x2x128xf32> to vector<2x128xf32>
    %23 = arith.truncf %19 : vector<2x32xf32> to vector<2x32xbf16>
    %cst_12 = arith.constant dense<0.000000e+00> : vector<2x128xf32>
    %24 = tpu.matmul %23, %13, %cst_12 {dimension_numbers = #tpu.dot_dimension_numbers<[1], [0], [0], [1], [0, 0, 1, 1], [], []>} : vector<2x32xbf16>, vector<32x128xbf16>, vector<2x128xf32> -> vector<2x128xf32>
    %25 = arith.addf %22, %24 : vector<2x128xf32>
    %26 = arith.mulf %25, %8 : vector<2x128xf32>
    %27 = math.tanh %26 : vector<2x128xf32>
    %28 = vector.extract_strided_slice %27 {offsets = [0, 0], sizes = [2, 32], strides = [1, 1]} : vector<2x128xf32> to vector<2x32xf32>
    %cst_13 = arith.constant 5.000000e-01 : f32
    %29 = vector.broadcast %cst_13 : f32 to vector<2x32xf32>
    %30 = arith.mulf %29, %28 : vector<2x32xf32>
    %cst_14 = arith.constant 5.000000e-01 : f32
    %31 = vector.broadcast %cst_14 : f32 to vector<2x32xf32>
    %32 = arith.addf %30, %31 : vector<2x32xf32>
    %33 = vector.extract_strided_slice %27 {offsets = [0, 32], sizes = [2, 32], strides = [1, 1]} : vector<2x128xf32> to vector<2x32xf32>
    %cst_15 = arith.constant 5.000000e-01 : f32
    %34 = vector.broadcast %cst_15 : f32 to vector<2x32xf32>
    %35 = arith.mulf %34, %33 : vector<2x32xf32>
    %cst_16 = arith.constant 5.000000e-01 : f32
    %36 = vector.broadcast %cst_16 : f32 to vector<2x32xf32>
    %37 = arith.addf %35, %36 : vector<2x32xf32>
    %38 = vector.extract_strided_slice %27 {offsets = [0, 64], sizes = [2, 32], strides = [1, 1]} : vector<2x128xf32> to vector<2x32xf32>
    %39 = vector.extract_strided_slice %27 {offsets = [0, 96], sizes = [2, 32], strides = [1, 1]} : vector<2x128xf32> to vector<2x32xf32>
    %cst_17 = arith.constant 5.000000e-01 : f32
    %40 = vector.broadcast %cst_17 : f32 to vector<2x32xf32>
    %41 = arith.mulf %40, %39 : vector<2x32xf32>
    %cst_18 = arith.constant 5.000000e-01 : f32
    %42 = vector.broadcast %cst_18 : f32 to vector<2x32xf32>
    %43 = arith.addf %41, %42 : vector<2x32xf32>
    %44 = arith.mulf %37, %20 : vector<2x32xf32>
    %45 = arith.mulf %32, %38 : vector<2x32xf32>
    %46 = arith.addf %44, %45 : vector<2x32xf32>
    %47 = math.tanh %46 : vector<2x32xf32>
    %48 = arith.mulf %43, %47 : vector<2x32xf32>
    %49 = arith.truncf %48 : vector<2x32xf32> to vector<2x32xbf16>
    %c0_19 = arith.constant 0 : index
    %c0_20 = arith.constant 0 : index
    %c0_21 = arith.constant 0 : index
    %50 = vector.load %arg10[%c0_19, %c0_20, %c0_21] : memref<8x2x32xbf16, #tpu.memory_space<vmem>>, vector<1x2x32xbf16>
    %51 = vector.shape_cast %50 : vector<1x2x32xbf16> to vector<2x32xbf16>
    %52 = vector.shape_cast %49 : vector<2x32xbf16> to vector<1x2x32xbf16>
    tpu.vector_store %arg10[%c0_19, %c0_20, %c0_21], %52 {strides = array<i32>} : memref<8x2x32xbf16, #tpu.memory_space<vmem>>, vector<1x2x32xbf16>,
    %53 = vector.extract_strided_slice %18 {offsets = [1, 0, 0], sizes = [1, 2, 128], strides = [1, 1, 1]} : vector<8x2x128xf32> to vector<1x2x128xf32>
    %54 = vector.shape_cast %53 : vector<1x2x128xf32> to vector<2x128xf32>
    %55 = arith.truncf %48 : vector<2x32xf32> to vector<2x32xbf16>
    %cst_22 = arith.constant dense<0.000000e+00> : vector<2x128xf32>
    %56 = tpu.matmul %55, %13, %cst_22 {dimension_numbers = #tpu.dot_dimension_numbers<[1], [0], [0], [1], [0, 0, 1, 1], [], []>} : vector<2x32xbf16>, vector<32x128xbf16>, vector<2x128xf32> -> vector<2x128xf32>
    %57 = arith.addf %54, %56 : vector<2x128xf32>
    %58 = arith.mulf %57, %8 : vector<2x128xf32>
    %59 = math.tanh %58 : vector<2x128xf32>
    %60 = vector.extract_strided_slice %59 {offsets = [0, 0], sizes = [2, 32], strides = [1, 1]} : vector<2x128xf32> to vector<2x32xf32>
    %cst_23 = arith.constant 5.000000e-01 : f32
    %61 = vector.broadcast %cst_23 : f32 to vector<2x32xf32>
    %62 = arith.mulf %61, %60 : vector<2x32xf32>
    %cst_24 = arith.constant 5.000000e-01 : f32
    %63 = vector.broadcast %cst_24 : f32 to vector<2x32xf32>
    %64 = arith.addf %62, %63 : vector<2x32xf32>
    %65 = vector.extract_strided_slice %59 {offsets = [0, 32], sizes = [2, 32], strides = [1, 1]} : vector<2x128xf32> to vector<2x32xf32>
    %cst_25 = arith.constant 5.000000e-01 : f32
    %66 = vector.broadcast %cst_25 : f32 to vector<2x32xf32>
    %67 = arith.mulf %66, %65 : vector<2x32xf32>
    %cst_26 = arith.constant 5.000000e-01 : f32
    %68 = vector.broadcast %cst_26 : f32 to vector<2x32xf32>
    %69 = arith.addf %67, %68 : vector<2x32xf32>
    %70 = vector.extract_strided_slice %59 {offsets = [0, 64], sizes = [2, 32], strides = [1, 1]} : vector<2x128xf32> to vector<2x32xf32>
    %71 = vector.extract_strided_slice %59 {offsets = [0, 96], sizes = [2, 32], strides = [1, 1]} : vector<2x128xf32> to vector<2x32xf32>
    %cst_27 = arith.constant 5.000000e-01 : f32
    %72 = vector.broadcast %cst_27 : f32 to vector<2x32xf32>
    %73 = arith.mulf %72, %71 : vector<2x32xf32>
    %cst_28 = arith.constant 5.000000e-01 : f32
    %74 = vector.broadcast %cst_28 : f32 to vector<2x32xf32>
    %75 = arith.addf %73, %74 : vector<2x32xf32>
    %76 = arith.mulf %69, %46 : vector<2x32xf32>
    %77 = arith.mulf %64, %70 : vector<2x32xf32>
    %78 = arith.addf %76, %77 : vector<2x32xf32>
    %79 = math.tanh %78 : vector<2x32xf32>
    %80 = arith.mulf %75, %79 : vector<2x32xf32>
    %81 = arith.truncf %80 : vector<2x32xf32> to vector<2x32xbf16>
    %c1 = arith.constant 1 : index
    %c0_29 = arith.constant 0 : index
    %c0_30 = arith.constant 0 : index
    %82 = vector.load %arg10[%c1, %c0_29, %c0_30] : memref<8x2x32xbf16, #tpu.memory_space<vmem>>, vector<1x2x32xbf16>
    %83 = vector.shape_cast %82 : vector<1x2x32xbf16> to vector<2x32xbf16>
    %84 = vector.shape_cast %81 : vector<2x32xbf16> to vector<1x2x32xbf16>
    tpu.vector_store %arg10[%c1, %c0_29, %c0_30], %84 {strides = array<i32>} : memref<8x2x32xbf16, #tpu.memory_space<vmem>>, vector<1x2x32xbf16>,
    %85 = vector.extract_strided_slice %18 {offsets = [2, 0, 0], sizes = [1, 2, 128], strides = [1, 1, 1]} : vector<8x2x128xf32> to vector<1x2x128xf32>
    %86 = vector.shape_cast %85 : vector<1x2x128xf32> to vector<2x128xf32>
    %87 = arith.truncf %80 : vector<2x32xf32> to vector<2x32xbf16>
    %cst_31 = arith.constant dense<0.000000e+00> : vector<2x128xf32>
    %88 = tpu.matmul %87, %13, %cst_31 {dimension_numbers = #tpu.dot_dimension_numbers<[1], [0], [0], [1], [0, 0, 1, 1], [], []>} : vector<2x32xbf16>, vector<32x128xbf16>, vector<2x128xf32> -> vector<2x128xf32>
    %89 = arith.addf %86, %88 : vector<2x128xf32>
    %90 = arith.mulf %89, %8 : vector<2x128xf32>
    %91 = math.tanh %90 : vector<2x128xf32>
    %92 = vector.extract_strided_slice %91 {offsets = [0, 0], sizes = [2, 32], strides = [1, 1]} : vector<2x128xf32> to vector<2x32xf32>
    %cst_32 = arith.constant 5.000000e-01 : f32
    %93 = vector.broadcast %cst_32 : f32 to vector<2x32xf32>
    %94 = arith.mulf %93, %92 : vector<2x32xf32>
    %cst_33 = arith.constant 5.000000e-01 : f32
    %95 = vector.broadcast %cst_33 : f32 to vector<2x32xf32>
    %96 = arith.addf %94, %95 : vector<2x32xf32>
    %97 = vector.extract_strided_slice %91 {offsets = [0, 32], sizes = [2, 32], strides = [1, 1]} : vector<2x128xf32> to vector<2x32xf32>
    %cst_34 = arith.constant 5.000000e-01 : f32
    %98 = vector.broadcast %cst_34 : f32 to vector<2x32xf32>
    %99 = arith.mulf %98, %97 : vector<2x32xf32>
    %cst_35 = arith.constant 5.000000e-01 : f32
    %100 = vector.broadcast %cst_35 : f32 to vector<2x32xf32>
    %101 = arith.addf %99, %100 : vector<2x32xf32>
    %102 = vector.extract_strided_slice %91 {offsets = [0, 64], sizes = [2, 32], strides = [1, 1]} : vector<2x128xf32> to vector<2x32xf32>
    %103 = vector.extract_strided_slice %91 {offsets = [0, 96], sizes = [2, 32], strides = [1, 1]} : vector<2x128xf32> to vector<2x32xf32>
    %cst_36 = arith.constant 5.000000e-01 : f32
    %104 = vector.broadcast %cst_36 : f32 to vector<2x32xf32>
    %105 = arith.mulf %104, %103 : vector<2x32xf32>
    %cst_37 = arith.constant 5.000000e-01 : f32
    %106 = vector.broadcast %cst_37 : f32 to vector<2x32xf32>
    %107 = arith.addf %105, %106 : vector<2x32xf32>
    %108 = arith.mulf %101, %78 : vector<2x32xf32>
    %109 = arith.mulf %96, %102 : vector<2x32xf32>
    %110 = arith.addf %108, %109 : vector<2x32xf32>
    %111 = math.tanh %110 : vector<2x32xf32>
    %112 = arith.mulf %107, %111 : vector<2x32xf32>
    %113 = arith.truncf %112 : vector<2x32xf32> to vector<2x32xbf16>
    %c2 = arith.constant 2 : index
    %c0_38 = arith.constant 0 : index
    %c0_39 = arith.constant 0 : index
    %114 = vector.load %arg10[%c2, %c0_38, %c0_39] : memref<8x2x32xbf16, #tpu.memory_space<vmem>>, vector<1x2x32xbf16>
    %115 = vector.shape_cast %114 : vector<1x2x32xbf16> to vector<2x32xbf16>
    %116 = vector.shape_cast %113 : vector<2x32xbf16> to vector<1x2x32xbf16>
    tpu.vector_store %arg10[%c2, %c0_38, %c0_39], %116 {strides = array<i32>} : memref<8x2x32xbf16, #tpu.memory_space<vmem>>, vector<1x2x32xbf16>,
    %117 = vector.extract_strided_slice %18 {offsets = [3, 0, 0], sizes = [1, 2, 128], strides = [1, 1, 1]} : vector<8x2x128xf32> to vector<1x2x128xf32>
    %118 = vector.shape_cast %117 : vector<1x2x128xf32> to vector<2x128xf32>
    %119 = arith.truncf %112 : vector<2x32xf32> to vector<2x32xbf16>
    %cst_40 = arith.constant dense<0.000000e+00> : vector<2x128xf32>
    %120 = tpu.matmul %119, %13, %cst_40 {dimension_numbers = #tpu.dot_dimension_numbers<[1], [0], [0], [1], [0, 0, 1, 1], [], []>} : vector<2x32xbf16>, vector<32x128xbf16>, vector<2x128xf32> -> vector<2x128xf32>
    %121 = arith.addf %118, %120 : vector<2x128xf32>
    %122 = arith.mulf %121, %8 : vector<2x128xf32>
    %123 = math.tanh %122 : vector<2x128xf32>
    %124 = vector.extract_strided_slice %123 {offsets = [0, 0], sizes = [2, 32], strides = [1, 1]} : vector<2x128xf32> to vector<2x32xf32>
    %cst_41 = arith.constant 5.000000e-01 : f32
    %125 = vector.broadcast %cst_41 : f32 to vector<2x32xf32>
    %126 = arith.mulf %125, %124 : vector<2x32xf32>
    %cst_42 = arith.constant 5.000000e-01 : f32
    %127 = vector.broadcast %cst_42 : f32 to vector<2x32xf32>
    %128 = arith.addf %126, %127 : vector<2x32xf32>
    %129 = vector.extract_strided_slice %123 {offsets = [0, 32], sizes = [2, 32], strides = [1, 1]} : vector<2x128xf32> to vector<2x32xf32>
    %cst_43 = arith.constant 5.000000e-01 : f32
    %130 = vector.broadcast %cst_43 : f32 to vector<2x32xf32>
    %131 = arith.mulf %130, %129 : vector<2x32xf32>
    %cst_44 = arith.constant 5.000000e-01 : f32
    %132 = vector.broadcast %cst_44 : f32 to vector<2x32xf32>
    %133 = arith.addf %131, %132 : vector<2x32xf32>
    %134 = vector.extract_strided_slice %123 {offsets = [0, 64], sizes = [2, 32], strides = [1, 1]} : vector<2x128xf32> to vector<2x32xf32>
    %135 = vector.extract_strided_slice %123 {offsets = [0, 96], sizes = [2, 32], strides = [1, 1]} : vector<2x128xf32> to vector<2x32xf32>
    %cst_45 = arith.constant 5.000000e-01 : f32
    %136 = vector.broadcast %cst_45 : f32 to vector<2x32xf32>
    %137 = arith.mulf %136, %135 : vector<2x32xf32>
    %cst_46 = arith.constant 5.000000e-01 : f32
    %138 = vector.broadcast %cst_46 : f32 to vector<2x32xf32>
    %139 = arith.addf %137, %138 : vector<2x32xf32>
    %140 = arith.mulf %133, %110 : vector<2x32xf32>
    %141 = arith.mulf %128, %134 : vector<2x32xf32>
    %142 = arith.addf %140, %141 : vector<2x32xf32>
    %143 = math.tanh %142 : vector<2x32xf32>
    %144 = arith.mulf %139, %143 : vector<2x32xf32>
    %145 = arith.truncf %144 : vector<2x32xf32> to vector<2x32xbf16>
    %c3 = arith.constant 3 : index
    %c0_47 = arith.constant 0 : index
    %c0_48 = arith.constant 0 : index
    %146 = vector.load %arg10[%c3, %c0_47, %c0_48] : memref<8x2x32xbf16, #tpu.memory_space<vmem>>, vector<1x2x32xbf16>
    %147 = vector.shape_cast %146 : vector<1x2x32xbf16> to vector<2x32xbf16>
    %148 = vector.shape_cast %145 : vector<2x32xbf16> to vector<1x2x32xbf16>
    tpu.vector_store %arg10[%c3, %c0_47, %c0_48], %148 {strides = array<i32>} : memref<8x2x32xbf16, #tpu.memory_space<vmem>>, vector<1x2x32xbf16>,
    %149 = vector.extract_strided_slice %18 {offsets = [4, 0, 0], sizes = [1, 2, 128], strides = [1, 1, 1]} : vector<8x2x128xf32> to vector<1x2x128xf32>
    %150 = vector.shape_cast %149 : vector<1x2x128xf32> to vector<2x128xf32>
    %151 = arith.truncf %144 : vector<2x32xf32> to vector<2x32xbf16>
    %cst_49 = arith.constant dense<0.000000e+00> : vector<2x128xf32>
    %152 = tpu.matmul %151, %13, %cst_49 {dimension_numbers = #tpu.dot_dimension_numbers<[1], [0], [0], [1], [0, 0, 1, 1], [], []>} : vector<2x32xbf16>, vector<32x128xbf16>, vector<2x128xf32> -> vector<2x128xf32>
    %153 = arith.addf %150, %152 : vector<2x128xf32>
    %154 = arith.mulf %153, %8 : vector<2x128xf32>
    %155 = math.tanh %154 : vector<2x128xf32>
    %156 = vector.extract_strided_slice %155 {offsets = [0, 0], sizes = [2, 32], strides = [1, 1]} : vector<2x128xf32> to vector<2x32xf32>
    %cst_50 = arith.constant 5.000000e-01 : f32
    %157 = vector.broadcast %cst_50 : f32 to vector<2x32xf32>
    %158 = arith.mulf %157, %156 : vector<2x32xf32>
    %cst_51 = arith.constant 5.000000e-01 : f32
    %159 = vector.broadcast %cst_51 : f32 to vector<2x32xf32>
    %160 = arith.addf %158, %159 : vector<2x32xf32>
    %161 = vector.extract_strided_slice %155 {offsets = [0, 32], sizes = [2, 32], strides = [1, 1]} : vector<2x128xf32> to vector<2x32xf32>
    %cst_52 = arith.constant 5.000000e-01 : f32
    %162 = vector.broadcast %cst_52 : f32 to vector<2x32xf32>
    %163 = arith.mulf %162, %161 : vector<2x32xf32>
    %cst_53 = arith.constant 5.000000e-01 : f32
    %164 = vector.broadcast %cst_53 : f32 to vector<2x32xf32>
    %165 = arith.addf %163, %164 : vector<2x32xf32>
    %166 = vector.extract_strided_slice %155 {offsets = [0, 64], sizes = [2, 32], strides = [1, 1]} : vector<2x128xf32> to vector<2x32xf32>
    %167 = vector.extract_strided_slice %155 {offsets = [0, 96], sizes = [2, 32], strides = [1, 1]} : vector<2x128xf32> to vector<2x32xf32>
    %cst_54 = arith.constant 5.000000e-01 : f32
    %168 = vector.broadcast %cst_54 : f32 to vector<2x32xf32>
    %169 = arith.mulf %168, %167 : vector<2x32xf32>
    %cst_55 = arith.constant 5.000000e-01 : f32
    %170 = vector.broadcast %cst_55 : f32 to vector<2x32xf32>
    %171 = arith.addf %169, %170 : vector<2x32xf32>
    %172 = arith.mulf %165, %142 : vector<2x32xf32>
    %173 = arith.mulf %160, %166 : vector<2x32xf32>
    %174 = arith.addf %172, %173 : vector<2x32xf32>
    %175 = math.tanh %174 : vector<2x32xf32>
    %176 = arith.mulf %171, %175 : vector<2x32xf32>
    %177 = arith.truncf %176 : vector<2x32xf32> to vector<2x32xbf16>
    %c4 = arith.constant 4 : index
    %c0_56 = arith.constant 0 : index
    %c0_57 = arith.constant 0 : index
    %178 = vector.load %arg10[%c4, %c0_56, %c0_57] : memref<8x2x32xbf16, #tpu.memory_space<vmem>>, vector<1x2x32xbf16>
    %179 = vector.shape_cast %178 : vector<1x2x32xbf16> to vector<2x32xbf16>
    %180 = vector.shape_cast %177 : vector<2x32xbf16> to vector<1x2x32xbf16>
    tpu.vector_store %arg10[%c4, %c0_56, %c0_57], %180 {strides = array<i32>} : memref<8x2x32xbf16, #tpu.memory_space<vmem>>, vector<1x2x32xbf16>,
    %181 = vector.extract_strided_slice %18 {offsets = [5, 0, 0], sizes = [1, 2, 128], strides = [1, 1, 1]} : vector<8x2x128xf32> to vector<1x2x128xf32>
    %182 = vector.shape_cast %181 : vector<1x2x128xf32> to vector<2x128xf32>
    %183 = arith.truncf %176 : vector<2x32xf32> to vector<2x32xbf16>
    %cst_58 = arith.constant dense<0.000000e+00> : vector<2x128xf32>
    %184 = tpu.matmul %183, %13, %cst_58 {dimension_numbers = #tpu.dot_dimension_numbers<[1], [0], [0], [1], [0, 0, 1, 1], [], []>} : vector<2x32xbf16>, vector<32x128xbf16>, vector<2x128xf32> -> vector<2x128xf32>
    %185 = arith.addf %182, %184 : vector<2x128xf32>
    %186 = arith.mulf %185, %8 : vector<2x128xf32>
    %187 = math.tanh %186 : vector<2x128xf32>
    %188 = vector.extract_strided_slice %187 {offsets = [0, 0], sizes = [2, 32], strides = [1, 1]} : vector<2x128xf32> to vector<2x32xf32>
    %cst_59 = arith.constant 5.000000e-01 : f32
    %189 = vector.broadcast %cst_59 : f32 to vector<2x32xf32>
    %190 = arith.mulf %189, %188 : vector<2x32xf32>
    %cst_60 = arith.constant 5.000000e-01 : f32
    %191 = vector.broadcast %cst_60 : f32 to vector<2x32xf32>
    %192 = arith.addf %190, %191 : vector<2x32xf32>
    %193 = vector.extract_strided_slice %187 {offsets = [0, 32], sizes = [2, 32], strides = [1, 1]} : vector<2x128xf32> to vector<2x32xf32>
    %cst_61 = arith.constant 5.000000e-01 : f32
    %194 = vector.broadcast %cst_61 : f32 to vector<2x32xf32>
    %195 = arith.mulf %194, %193 : vector<2x32xf32>
    %cst_62 = arith.constant 5.000000e-01 : f32
    %196 = vector.broadcast %cst_62 : f32 to vector<2x32xf32>
    %197 = arith.addf %195, %196 : vector<2x32xf32>
    %198 = vector.extract_strided_slice %187 {offsets = [0, 64], sizes = [2, 32], strides = [1, 1]} : vector<2x128xf32> to vector<2x32xf32>
    %199 = vector.extract_strided_slice %187 {offsets = [0, 96], sizes = [2, 32], strides = [1, 1]} : vector<2x128xf32> to vector<2x32xf32>
    %cst_63 = arith.constant 5.000000e-01 : f32
    %200 = vector.broadcast %cst_63 : f32 to vector<2x32xf32>
    %201 = arith.mulf %200, %199 : vector<2x32xf32>
    %cst_64 = arith.constant 5.000000e-01 : f32
    %202 = vector.broadcast %cst_64 : f32 to vector<2x32xf32>
    %203 = arith.addf %201, %202 : vector<2x32xf32>
    %204 = arith.mulf %197, %174 : vector<2x32xf32>
    %205 = arith.mulf %192, %198 : vector<2x32xf32>
    %206 = arith.addf %204, %205 : vector<2x32xf32>
    %207 = math.tanh %206 : vector<2x32xf32>
    %208 = arith.mulf %203, %207 : vector<2x32xf32>
    %209 = arith.truncf %208 : vector<2x32xf32> to vector<2x32xbf16>
    %c5 = arith.constant 5 : index
    %c0_65 = arith.constant 0 : index
    %c0_66 = arith.constant 0 : index
    %210 = vector.load %arg10[%c5, %c0_65, %c0_66] : memref<8x2x32xbf16, #tpu.memory_space<vmem>>, vector<1x2x32xbf16>
    %211 = vector.shape_cast %210 : vector<1x2x32xbf16> to vector<2x32xbf16>
    %212 = vector.shape_cast %209 : vector<2x32xbf16> to vector<1x2x32xbf16>
    tpu.vector_store %arg10[%c5, %c0_65, %c0_66], %212 {strides = array<i32>} : memref<8x2x32xbf16, #tpu.memory_space<vmem>>, vector<1x2x32xbf16>,
    %213 = vector.extract_strided_slice %18 {offsets = [6, 0, 0], sizes = [1, 2, 128], strides = [1, 1, 1]} : vector<8x2x128xf32> to vector<1x2x128xf32>
    %214 = vector.shape_cast %213 : vector<1x2x128xf32> to vector<2x128xf32>
    %215 = arith.truncf %208 : vector<2x32xf32> to vector<2x32xbf16>
    %cst_67 = arith.constant dense<0.000000e+00> : vector<2x128xf32>
    %216 = tpu.matmul %215, %13, %cst_67 {dimension_numbers = #tpu.dot_dimension_numbers<[1], [0], [0], [1], [0, 0, 1, 1], [], []>} : vector<2x32xbf16>, vector<32x128xbf16>, vector<2x128xf32> -> vector<2x128xf32>
    %217 = arith.addf %214, %216 : vector<2x128xf32>
    %218 = arith.mulf %217, %8 : vector<2x128xf32>
    %219 = math.tanh %218 : vector<2x128xf32>
    %220 = vector.extract_strided_slice %219 {offsets = [0, 0], sizes = [2, 32], strides = [1, 1]} : vector<2x128xf32> to vector<2x32xf32>
    %cst_68 = arith.constant 5.000000e-01 : f32
    %221 = vector.broadcast %cst_68 : f32 to vector<2x32xf32>
    %222 = arith.mulf %221, %220 : vector<2x32xf32>
    %cst_69 = arith.constant 5.000000e-01 : f32
    %223 = vector.broadcast %cst_69 : f32 to vector<2x32xf32>
    %224 = arith.addf %222, %223 : vector<2x32xf32>
    %225 = vector.extract_strided_slice %219 {offsets = [0, 32], sizes = [2, 32], strides = [1, 1]} : vector<2x128xf32> to vector<2x32xf32>
    %cst_70 = arith.constant 5.000000e-01 : f32
    %226 = vector.broadcast %cst_70 : f32 to vector<2x32xf32>
    %227 = arith.mulf %226, %225 : vector<2x32xf32>
    %cst_71 = arith.constant 5.000000e-01 : f32
    %228 = vector.broadcast %cst_71 : f32 to vector<2x32xf32>
    %229 = arith.addf %227, %228 : vector<2x32xf32>
    %230 = vector.extract_strided_slice %219 {offsets = [0, 64], sizes = [2, 32], strides = [1, 1]} : vector<2x128xf32> to vector<2x32xf32>
    %231 = vector.extract_strided_slice %219 {offsets = [0, 96], sizes = [2, 32], strides = [1, 1]} : vector<2x128xf32> to vector<2x32xf32>
    %cst_72 = arith.constant 5.000000e-01 : f32
    %232 = vector.broadcast %cst_72 : f32 to vector<2x32xf32>
    %233 = arith.mulf %232, %231 : vector<2x32xf32>
    %cst_73 = arith.constant 5.000000e-01 : f32
    %234 = vector.broadcast %cst_73 : f32 to vector<2x32xf32>
    %235 = arith.addf %233, %234 : vector<2x32xf32>
    %236 = arith.mulf %229, %206 : vector<2x32xf32>
    %237 = arith.mulf %224, %230 : vector<2x32xf32>
    %238 = arith.addf %236, %237 : vector<2x32xf32>
    %239 = math.tanh %238 : vector<2x32xf32>
    %240 = arith.mulf %235, %239 : vector<2x32xf32>
    %241 = arith.truncf %240 : vector<2x32xf32> to vector<2x32xbf16>
    %c6 = arith.constant 6 : index
    %c0_74 = arith.constant 0 : index
    %c0_75 = arith.constant 0 : index
    %242 = vector.load %arg10[%c6, %c0_74, %c0_75] : memref<8x2x32xbf16, #tpu.memory_space<vmem>>, vector<1x2x32xbf16>
    %243 = vector.shape_cast %242 : vector<1x2x32xbf16> to vector<2x32xbf16>
    %244 = vector.shape_cast %241 : vector<2x32xbf16> to vector<1x2x32xbf16>
    tpu.vector_store %arg10[%c6, %c0_74, %c0_75], %244 {strides = array<i32>} : memref<8x2x32xbf16, #tpu.memory_space<vmem>>, vector<1x2x32xbf16>,
    %245 = vector.extract_strided_slice %18 {offsets = [7, 0, 0], sizes = [1, 2, 128], strides = [1, 1, 1]} : vector<8x2x128xf32> to vector<1x2x128xf32>
    %246 = vector.shape_cast %245 : vector<1x2x128xf32> to vector<2x128xf32>
    %247 = arith.truncf %240 : vector<2x32xf32> to vector<2x32xbf16>
    %cst_76 = arith.constant dense<0.000000e+00> : vector<2x128xf32>
    %248 = tpu.matmul %247, %13, %cst_76 {dimension_numbers = #tpu.dot_dimension_numbers<[1], [0], [0], [1], [0, 0, 1, 1], [], []>} : vector<2x32xbf16>, vector<32x128xbf16>, vector<2x128xf32> -> vector<2x128xf32>
    %249 = arith.addf %246, %248 : vector<2x128xf32>
    %250 = arith.mulf %249, %8 : vector<2x128xf32>
    %251 = math.tanh %250 : vector<2x128xf32>
    %252 = vector.extract_strided_slice %251 {offsets = [0, 0], sizes = [2, 32], strides = [1, 1]} : vector<2x128xf32> to vector<2x32xf32>
    %cst_77 = arith.constant 5.000000e-01 : f32
    %253 = vector.broadcast %cst_77 : f32 to vector<2x32xf32>
    %254 = arith.mulf %253, %252 : vector<2x32xf32>
    %cst_78 = arith.constant 5.000000e-01 : f32
    %255 = vector.broadcast %cst_78 : f32 to vector<2x32xf32>
    %256 = arith.addf %254, %255 : vector<2x32xf32>
    %257 = vector.extract_strided_slice %251 {offsets = [0, 32], sizes = [2, 32], strides = [1, 1]} : vector<2x128xf32> to vector<2x32xf32>
    %cst_79 = arith.constant 5.000000e-01 : f32
    %258 = vector.broadcast %cst_79 : f32 to vector<2x32xf32>
    %259 = arith.mulf %258, %257 : vector<2x32xf32>
    %cst_80 = arith.constant 5.000000e-01 : f32
    %260 = vector.broadcast %cst_80 : f32 to vector<2x32xf32>
    %261 = arith.addf %259, %260 : vector<2x32xf32>
    %262 = vector.extract_strided_slice %251 {offsets = [0, 64], sizes = [2, 32], strides = [1, 1]} : vector<2x128xf32> to vector<2x32xf32>
    %263 = vector.extract_strided_slice %251 {offsets = [0, 96], sizes = [2, 32], strides = [1, 1]} : vector<2x128xf32> to vector<2x32xf32>
    %cst_81 = arith.constant 5.000000e-01 : f32
    %264 = vector.broadcast %cst_81 : f32 to vector<2x32xf32>
    %265 = arith.mulf %264, %263 : vector<2x32xf32>
    %cst_82 = arith.constant 5.000000e-01 : f32
    %266 = vector.broadcast %cst_82 : f32 to vector<2x32xf32>
    %267 = arith.addf %265, %266 : vector<2x32xf32>
    %268 = arith.mulf %261, %238 : vector<2x32xf32>
    %269 = arith.mulf %256, %262 : vector<2x32xf32>
    %270 = arith.addf %268, %269 : vector<2x32xf32>
    %271 = math.tanh %270 : vector<2x32xf32>
    %272 = arith.mulf %267, %271 : vector<2x32xf32>
    %273 = arith.truncf %272 : vector<2x32xf32> to vector<2x32xbf16>
    %c7 = arith.constant 7 : index
    %c0_83 = arith.constant 0 : index
    %c0_84 = arith.constant 0 : index
    %274 = vector.load %arg10[%c7, %c0_83, %c0_84] : memref<8x2x32xbf16, #tpu.memory_space<vmem>>, vector<1x2x32xbf16>
    %275 = vector.shape_cast %274 : vector<1x2x32xbf16> to vector<2x32xbf16>
    %276 = vector.shape_cast %273 : vector<2x32xbf16> to vector<1x2x32xbf16>
    tpu.vector_store %arg10[%c7, %c0_83, %c0_84], %276 {strides = array<i32>} : memref<8x2x32xbf16, #tpu.memory_space<vmem>>, vector<1x2x32xbf16>,
    %c0_85 = arith.constant 0 : index
    %c0_86 = arith.constant 0 : index
    %c0_87 = arith.constant 0 : index
    %277 = vector.load %arg10[%c0_85, %c0_86, %c0_87] : memref<8x2x32xbf16, #tpu.memory_space<vmem>>, vector<8x2x32xbf16>
    %278 = vector.shape_cast %277 : vector<8x2x32xbf16> to vector<16x32xbf16>
    %c0_88 = arith.constant 0 : index
    %c0_89 = arith.constant 0 : index
    %279 = vector.load %arg4[%c0_88, %c0_89] : memref<32x128xbf16, #tpu.memory_space<vmem>>, vector<32x128xbf16>
    %c0_90 = arith.constant 0 : index
    %c0_91 = arith.constant 0 : index
    %280 = vector.load %arg5[%c0_90, %c0_91] : memref<32x128xbf16, #tpu.memory_space<vmem>>, vector<32x128xbf16>
    %c0_92 = arith.constant 0 : index
    %c0_93 = arith.constant 0 : index
    %281 = vector.load %arg6[%c0_92, %c0_93] : memref<1x128xf32, #tpu.memory_space<vmem>>, vector<1x128xf32>
    %cst_94 = arith.constant dense<0.000000e+00> : vector<16x128xf32>
    %282 = tpu.matmul %278, %279, %cst_94 {dimension_numbers = #tpu.dot_dimension_numbers<[1], [0], [0], [1], [0, 0, 1, 1], [], []>} : vector<16x32xbf16>, vector<32x128xbf16>, vector<16x128xf32> -> vector<16x128xf32>
    %283 = vector.broadcast %281 : vector<1x128xf32> to vector<16x128xf32>
    %284 = arith.addf %282, %283 : vector<16x128xf32>
    %285 = vector.shape_cast %284 : vector<16x128xf32> to vector<8x2x128xf32>
    %cst_95 = arith.constant 0.000000e+00 : f32
    %286 = vector.broadcast %cst_95 : f32 to vector<2x32xf32>
    %cst_96 = arith.constant 0.000000e+00 : f32
    %287 = vector.broadcast %cst_96 : f32 to vector<2x32xf32>
    %288 = vector.extract_strided_slice %285 {offsets = [0, 0, 0], sizes = [1, 2, 128], strides = [1, 1, 1]} : vector<8x2x128xf32> to vector<1x2x128xf32>
    %289 = vector.shape_cast %288 : vector<1x2x128xf32> to vector<2x128xf32>
    %290 = arith.truncf %286 : vector<2x32xf32> to vector<2x32xbf16>
    %cst_97 = arith.constant dense<0.000000e+00> : vector<2x128xf32>
    %291 = tpu.matmul %290, %280, %cst_97 {dimension_numbers = #tpu.dot_dimension_numbers<[1], [0], [0], [1], [0, 0, 1, 1], [], []>} : vector<2x32xbf16>, vector<32x128xbf16>, vector<2x128xf32> -> vector<2x128xf32>
    %292 = arith.addf %289, %291 : vector<2x128xf32>
    %293 = arith.mulf %292, %8 : vector<2x128xf32>
    %294 = math.tanh %293 : vector<2x128xf32>
    %295 = vector.extract_strided_slice %294 {offsets = [0, 0], sizes = [2, 32], strides = [1, 1]} : vector<2x128xf32> to vector<2x32xf32>
    %cst_98 = arith.constant 5.000000e-01 : f32
    %296 = vector.broadcast %cst_98 : f32 to vector<2x32xf32>
    %297 = arith.mulf %296, %295 : vector<2x32xf32>
    %cst_99 = arith.constant 5.000000e-01 : f32
    %298 = vector.broadcast %cst_99 : f32 to vector<2x32xf32>
    %299 = arith.addf %297, %298 : vector<2x32xf32>
    %300 = vector.extract_strided_slice %294 {offsets = [0, 32], sizes = [2, 32], strides = [1, 1]} : vector<2x128xf32> to vector<2x32xf32>
    %cst_100 = arith.constant 5.000000e-01 : f32
    %301 = vector.broadcast %cst_100 : f32 to vector<2x32xf32>
    %302 = arith.mulf %301, %300 : vector<2x32xf32>
    %cst_101 = arith.constant 5.000000e-01 : f32
    %303 = vector.broadcast %cst_101 : f32 to vector<2x32xf32>
    %304 = arith.addf %302, %303 : vector<2x32xf32>
    %305 = vector.extract_strided_slice %294 {offsets = [0, 64], sizes = [2, 32], strides = [1, 1]} : vector<2x128xf32> to vector<2x32xf32>
    %306 = vector.extract_strided_slice %294 {offsets = [0, 96], sizes = [2, 32], strides = [1, 1]} : vector<2x128xf32> to vector<2x32xf32>
    %cst_102 = arith.constant 5.000000e-01 : f32
    %307 = vector.broadcast %cst_102 : f32 to vector<2x32xf32>
    %308 = arith.mulf %307, %306 : vector<2x32xf32>
    %cst_103 = arith.constant 5.000000e-01 : f32
    %309 = vector.broadcast %cst_103 : f32 to vector<2x32xf32>
    %310 = arith.addf %308, %309 : vector<2x32xf32>
    %311 = arith.mulf %304, %287 : vector<2x32xf32>
    %312 = arith.mulf %299, %305 : vector<2x32xf32>
    %313 = arith.addf %311, %312 : vector<2x32xf32>
    %314 = math.tanh %313 : vector<2x32xf32>
    %315 = arith.mulf %310, %314 : vector<2x32xf32>
    %316 = vector.extract_strided_slice %285 {offsets = [1, 0, 0], sizes = [1, 2, 128], strides = [1, 1, 1]} : vector<8x2x128xf32> to vector<1x2x128xf32>
    %317 = vector.shape_cast %316 : vector<1x2x128xf32> to vector<2x128xf32>
    %318 = arith.truncf %315 : vector<2x32xf32> to vector<2x32xbf16>
    %cst_104 = arith.constant dense<0.000000e+00> : vector<2x128xf32>
    %319 = tpu.matmul %318, %280, %cst_104 {dimension_numbers = #tpu.dot_dimension_numbers<[1], [0], [0], [1], [0, 0, 1, 1], [], []>} : vector<2x32xbf16>, vector<32x128xbf16>, vector<2x128xf32> -> vector<2x128xf32>
    %320 = arith.addf %317, %319 : vector<2x128xf32>
    %321 = arith.mulf %320, %8 : vector<2x128xf32>
    %322 = math.tanh %321 : vector<2x128xf32>
    %323 = vector.extract_strided_slice %322 {offsets = [0, 0], sizes = [2, 32], strides = [1, 1]} : vector<2x128xf32> to vector<2x32xf32>
    %cst_105 = arith.constant 5.000000e-01 : f32
    %324 = vector.broadcast %cst_105 : f32 to vector<2x32xf32>
    %325 = arith.mulf %324, %323 : vector<2x32xf32>
    %cst_106 = arith.constant 5.000000e-01 : f32
    %326 = vector.broadcast %cst_106 : f32 to vector<2x32xf32>
    %327 = arith.addf %325, %326 : vector<2x32xf32>
    %328 = vector.extract_strided_slice %322 {offsets = [0, 32], sizes = [2, 32], strides = [1, 1]} : vector<2x128xf32> to vector<2x32xf32>
    %cst_107 = arith.constant 5.000000e-01 : f32
    %329 = vector.broadcast %cst_107 : f32 to vector<2x32xf32>
    %330 = arith.mulf %329, %328 : vector<2x32xf32>
    %cst_108 = arith.constant 5.000000e-01 : f32
    %331 = vector.broadcast %cst_108 : f32 to vector<2x32xf32>
    %332 = arith.addf %330, %331 : vector<2x32xf32>
    %333 = vector.extract_strided_slice %322 {offsets = [0, 64], sizes = [2, 32], strides = [1, 1]} : vector<2x128xf32> to vector<2x32xf32>
    %334 = vector.extract_strided_slice %322 {offsets = [0, 96], sizes = [2, 32], strides = [1, 1]} : vector<2x128xf32> to vector<2x32xf32>
    %cst_109 = arith.constant 5.000000e-01 : f32
    %335 = vector.broadcast %cst_109 : f32 to vector<2x32xf32>
    %336 = arith.mulf %335, %334 : vector<2x32xf32>
    %cst_110 = arith.constant 5.000000e-01 : f32
    %337 = vector.broadcast %cst_110 : f32 to vector<2x32xf32>
    %338 = arith.addf %336, %337 : vector<2x32xf32>
    %339 = arith.mulf %332, %313 : vector<2x32xf32>
    %340 = arith.mulf %327, %333 : vector<2x32xf32>
    %341 = arith.addf %339, %340 : vector<2x32xf32>
    %342 = math.tanh %341 : vector<2x32xf32>
    %343 = arith.mulf %338, %342 : vector<2x32xf32>
    %344 = vector.extract_strided_slice %285 {offsets = [2, 0, 0], sizes = [1, 2, 128], strides = [1, 1, 1]} : vector<8x2x128xf32> to vector<1x2x128xf32>
    %345 = vector.shape_cast %344 : vector<1x2x128xf32> to vector<2x128xf32>
    %346 = arith.truncf %343 : vector<2x32xf32> to vector<2x32xbf16>
    %cst_111 = arith.constant dense<0.000000e+00> : vector<2x128xf32>
    %347 = tpu.matmul %346, %280, %cst_111 {dimension_numbers = #tpu.dot_dimension_numbers<[1], [0], [0], [1], [0, 0, 1, 1], [], []>} : vector<2x32xbf16>, vector<32x128xbf16>, vector<2x128xf32> -> vector<2x128xf32>
    %348 = arith.addf %345, %347 : vector<2x128xf32>
    %349 = arith.mulf %348, %8 : vector<2x128xf32>
    %350 = math.tanh %349 : vector<2x128xf32>
    %351 = vector.extract_strided_slice %350 {offsets = [0, 0], sizes = [2, 32], strides = [1, 1]} : vector<2x128xf32> to vector<2x32xf32>
    %cst_112 = arith.constant 5.000000e-01 : f32
    %352 = vector.broadcast %cst_112 : f32 to vector<2x32xf32>
    %353 = arith.mulf %352, %351 : vector<2x32xf32>
    %cst_113 = arith.constant 5.000000e-01 : f32
    %354 = vector.broadcast %cst_113 : f32 to vector<2x32xf32>
    %355 = arith.addf %353, %354 : vector<2x32xf32>
    %356 = vector.extract_strided_slice %350 {offsets = [0, 32], sizes = [2, 32], strides = [1, 1]} : vector<2x128xf32> to vector<2x32xf32>
    %cst_114 = arith.constant 5.000000e-01 : f32
    %357 = vector.broadcast %cst_114 : f32 to vector<2x32xf32>
    %358 = arith.mulf %357, %356 : vector<2x32xf32>
    %cst_115 = arith.constant 5.000000e-01 : f32
    %359 = vector.broadcast %cst_115 : f32 to vector<2x32xf32>
    %360 = arith.addf %358, %359 : vector<2x32xf32>
    %361 = vector.extract_strided_slice %350 {offsets = [0, 64], sizes = [2, 32], strides = [1, 1]} : vector<2x128xf32> to vector<2x32xf32>
    %362 = vector.extract_strided_slice %350 {offsets = [0, 96], sizes = [2, 32], strides = [1, 1]} : vector<2x128xf32> to vector<2x32xf32>
    %cst_116 = arith.constant 5.000000e-01 : f32
    %363 = vector.broadcast %cst_116 : f32 to vector<2x32xf32>
    %364 = arith.mulf %363, %362 : vector<2x32xf32>
    %cst_117 = arith.constant 5.000000e-01 : f32
    %365 = vector.broadcast %cst_117 : f32 to vector<2x32xf32>
    %366 = arith.addf %364, %365 : vector<2x32xf32>
    %367 = arith.mulf %360, %341 : vector<2x32xf32>
    %368 = arith.mulf %355, %361 : vector<2x32xf32>
    %369 = arith.addf %367, %368 : vector<2x32xf32>
    %370 = math.tanh %369 : vector<2x32xf32>
    %371 = arith.mulf %366, %370 : vector<2x32xf32>
    %372 = vector.extract_strided_slice %285 {offsets = [3, 0, 0], sizes = [1, 2, 128], strides = [1, 1, 1]} : vector<8x2x128xf32> to vector<1x2x128xf32>
    %373 = vector.shape_cast %372 : vector<1x2x128xf32> to vector<2x128xf32>
    %374 = arith.truncf %371 : vector<2x32xf32> to vector<2x32xbf16>
    %cst_118 = arith.constant dense<0.000000e+00> : vector<2x128xf32>
    %375 = tpu.matmul %374, %280, %cst_118 {dimension_numbers = #tpu.dot_dimension_numbers<[1], [0], [0], [1], [0, 0, 1, 1], [], []>} : vector<2x32xbf16>, vector<32x128xbf16>, vector<2x128xf32> -> vector<2x128xf32>
    %376 = arith.addf %373, %375 : vector<2x128xf32>
    %377 = arith.mulf %376, %8 : vector<2x128xf32>
    %378 = math.tanh %377 : vector<2x128xf32>
    %379 = vector.extract_strided_slice %378 {offsets = [0, 0], sizes = [2, 32], strides = [1, 1]} : vector<2x128xf32> to vector<2x32xf32>
    %cst_119 = arith.constant 5.000000e-01 : f32
    %380 = vector.broadcast %cst_119 : f32 to vector<2x32xf32>
    %381 = arith.mulf %380, %379 : vector<2x32xf32>
    %cst_120 = arith.constant 5.000000e-01 : f32
    %382 = vector.broadcast %cst_120 : f32 to vector<2x32xf32>
    %383 = arith.addf %381, %382 : vector<2x32xf32>
    %384 = vector.extract_strided_slice %378 {offsets = [0, 32], sizes = [2, 32], strides = [1, 1]} : vector<2x128xf32> to vector<2x32xf32>
    %cst_121 = arith.constant 5.000000e-01 : f32
    %385 = vector.broadcast %cst_121 : f32 to vector<2x32xf32>
    %386 = arith.mulf %385, %384 : vector<2x32xf32>
    %cst_122 = arith.constant 5.000000e-01 : f32
    %387 = vector.broadcast %cst_122 : f32 to vector<2x32xf32>
    %388 = arith.addf %386, %387 : vector<2x32xf32>
    %389 = vector.extract_strided_slice %378 {offsets = [0, 64], sizes = [2, 32], strides = [1, 1]} : vector<2x128xf32> to vector<2x32xf32>
    %390 = vector.extract_strided_slice %378 {offsets = [0, 96], sizes = [2, 32], strides = [1, 1]} : vector<2x128xf32> to vector<2x32xf32>
    %cst_123 = arith.constant 5.000000e-01 : f32
    %391 = vector.broadcast %cst_123 : f32 to vector<2x32xf32>
    %392 = arith.mulf %391, %390 : vector<2x32xf32>
    %cst_124 = arith.constant 5.000000e-01 : f32
    %393 = vector.broadcast %cst_124 : f32 to vector<2x32xf32>
    %394 = arith.addf %392, %393 : vector<2x32xf32>
    %395 = arith.mulf %388, %369 : vector<2x32xf32>
    %396 = arith.mulf %383, %389 : vector<2x32xf32>
    %397 = arith.addf %395, %396 : vector<2x32xf32>
    %398 = math.tanh %397 : vector<2x32xf32>
    %399 = arith.mulf %394, %398 : vector<2x32xf32>
    %400 = vector.extract_strided_slice %285 {offsets = [4, 0, 0], sizes = [1, 2, 128], strides = [1, 1, 1]} : vector<8x2x128xf32> to vector<1x2x128xf32>
    %401 = vector.shape_cast %400 : vector<1x2x128xf32> to vector<2x128xf32>
    %402 = arith.truncf %399 : vector<2x32xf32> to vector<2x32xbf16>
    %cst_125 = arith.constant dense<0.000000e+00> : vector<2x128xf32>
    %403 = tpu.matmul %402, %280, %cst_125 {dimension_numbers = #tpu.dot_dimension_numbers<[1], [0], [0], [1], [0, 0, 1, 1], [], []>} : vector<2x32xbf16>, vector<32x128xbf16>, vector<2x128xf32> -> vector<2x128xf32>
    %404 = arith.addf %401, %403 : vector<2x128xf32>
    %405 = arith.mulf %404, %8 : vector<2x128xf32>
    %406 = math.tanh %405 : vector<2x128xf32>
    %407 = vector.extract_strided_slice %406 {offsets = [0, 0], sizes = [2, 32], strides = [1, 1]} : vector<2x128xf32> to vector<2x32xf32>
    %cst_126 = arith.constant 5.000000e-01 : f32
    %408 = vector.broadcast %cst_126 : f32 to vector<2x32xf32>
    %409 = arith.mulf %408, %407 : vector<2x32xf32>
    %cst_127 = arith.constant 5.000000e-01 : f32
    %410 = vector.broadcast %cst_127 : f32 to vector<2x32xf32>
    %411 = arith.addf %409, %410 : vector<2x32xf32>
    %412 = vector.extract_strided_slice %406 {offsets = [0, 32], sizes = [2, 32], strides = [1, 1]} : vector<2x128xf32> to vector<2x32xf32>
    %cst_128 = arith.constant 5.000000e-01 : f32
    %413 = vector.broadcast %cst_128 : f32 to vector<2x32xf32>
    %414 = arith.mulf %413, %412 : vector<2x32xf32>
    %cst_129 = arith.constant 5.000000e-01 : f32
    %415 = vector.broadcast %cst_129 : f32 to vector<2x32xf32>
    %416 = arith.addf %414, %415 : vector<2x32xf32>
    %417 = vector.extract_strided_slice %406 {offsets = [0, 64], sizes = [2, 32], strides = [1, 1]} : vector<2x128xf32> to vector<2x32xf32>
    %418 = vector.extract_strided_slice %406 {offsets = [0, 96], sizes = [2, 32], strides = [1, 1]} : vector<2x128xf32> to vector<2x32xf32>
    %cst_130 = arith.constant 5.000000e-01 : f32
    %419 = vector.broadcast %cst_130 : f32 to vector<2x32xf32>
    %420 = arith.mulf %419, %418 : vector<2x32xf32>
    %cst_131 = arith.constant 5.000000e-01 : f32
    %421 = vector.broadcast %cst_131 : f32 to vector<2x32xf32>
    %422 = arith.addf %420, %421 : vector<2x32xf32>
    %423 = arith.mulf %416, %397 : vector<2x32xf32>
    %424 = arith.mulf %411, %417 : vector<2x32xf32>
    %425 = arith.addf %423, %424 : vector<2x32xf32>
    %426 = math.tanh %425 : vector<2x32xf32>
    %427 = arith.mulf %422, %426 : vector<2x32xf32>
    %428 = vector.extract_strided_slice %285 {offsets = [5, 0, 0], sizes = [1, 2, 128], strides = [1, 1, 1]} : vector<8x2x128xf32> to vector<1x2x128xf32>
    %429 = vector.shape_cast %428 : vector<1x2x128xf32> to vector<2x128xf32>
    %430 = arith.truncf %427 : vector<2x32xf32> to vector<2x32xbf16>
    %cst_132 = arith.constant dense<0.000000e+00> : vector<2x128xf32>
    %431 = tpu.matmul %430, %280, %cst_132 {dimension_numbers = #tpu.dot_dimension_numbers<[1], [0], [0], [1], [0, 0, 1, 1], [], []>} : vector<2x32xbf16>, vector<32x128xbf16>, vector<2x128xf32> -> vector<2x128xf32>
    %432 = arith.addf %429, %431 : vector<2x128xf32>
    %433 = arith.mulf %432, %8 : vector<2x128xf32>
    %434 = math.tanh %433 : vector<2x128xf32>
    %435 = vector.extract_strided_slice %434 {offsets = [0, 0], sizes = [2, 32], strides = [1, 1]} : vector<2x128xf32> to vector<2x32xf32>
    %cst_133 = arith.constant 5.000000e-01 : f32
    %436 = vector.broadcast %cst_133 : f32 to vector<2x32xf32>
    %437 = arith.mulf %436, %435 : vector<2x32xf32>
    %cst_134 = arith.constant 5.000000e-01 : f32
    %438 = vector.broadcast %cst_134 : f32 to vector<2x32xf32>
    %439 = arith.addf %437, %438 : vector<2x32xf32>
    %440 = vector.extract_strided_slice %434 {offsets = [0, 32], sizes = [2, 32], strides = [1, 1]} : vector<2x128xf32> to vector<2x32xf32>
    %cst_135 = arith.constant 5.000000e-01 : f32
    %441 = vector.broadcast %cst_135 : f32 to vector<2x32xf32>
    %442 = arith.mulf %441, %440 : vector<2x32xf32>
    %cst_136 = arith.constant 5.000000e-01 : f32
    %443 = vector.broadcast %cst_136 : f32 to vector<2x32xf32>
    %444 = arith.addf %442, %443 : vector<2x32xf32>
    %445 = vector.extract_strided_slice %434 {offsets = [0, 64], sizes = [2, 32], strides = [1, 1]} : vector<2x128xf32> to vector<2x32xf32>
    %446 = vector.extract_strided_slice %434 {offsets = [0, 96], sizes = [2, 32], strides = [1, 1]} : vector<2x128xf32> to vector<2x32xf32>
    %cst_137 = arith.constant 5.000000e-01 : f32
    %447 = vector.broadcast %cst_137 : f32 to vector<2x32xf32>
    %448 = arith.mulf %447, %446 : vector<2x32xf32>
    %cst_138 = arith.constant 5.000000e-01 : f32
    %449 = vector.broadcast %cst_138 : f32 to vector<2x32xf32>
    %450 = arith.addf %448, %449 : vector<2x32xf32>
    %451 = arith.mulf %444, %425 : vector<2x32xf32>
    %452 = arith.mulf %439, %445 : vector<2x32xf32>
    %453 = arith.addf %451, %452 : vector<2x32xf32>
    %454 = math.tanh %453 : vector<2x32xf32>
    %455 = arith.mulf %450, %454 : vector<2x32xf32>
    %456 = vector.extract_strided_slice %285 {offsets = [6, 0, 0], sizes = [1, 2, 128], strides = [1, 1, 1]} : vector<8x2x128xf32> to vector<1x2x128xf32>
    %457 = vector.shape_cast %456 : vector<1x2x128xf32> to vector<2x128xf32>
    %458 = arith.truncf %455 : vector<2x32xf32> to vector<2x32xbf16>
    %cst_139 = arith.constant dense<0.000000e+00> : vector<2x128xf32>
    %459 = tpu.matmul %458, %280, %cst_139 {dimension_numbers = #tpu.dot_dimension_numbers<[1], [0], [0], [1], [0, 0, 1, 1], [], []>} : vector<2x32xbf16>, vector<32x128xbf16>, vector<2x128xf32> -> vector<2x128xf32>
    %460 = arith.addf %457, %459 : vector<2x128xf32>
    %461 = arith.mulf %460, %8 : vector<2x128xf32>
    %462 = math.tanh %461 : vector<2x128xf32>
    %463 = vector.extract_strided_slice %462 {offsets = [0, 0], sizes = [2, 32], strides = [1, 1]} : vector<2x128xf32> to vector<2x32xf32>
    %cst_140 = arith.constant 5.000000e-01 : f32
    %464 = vector.broadcast %cst_140 : f32 to vector<2x32xf32>
    %465 = arith.mulf %464, %463 : vector<2x32xf32>
    %cst_141 = arith.constant 5.000000e-01 : f32
    %466 = vector.broadcast %cst_141 : f32 to vector<2x32xf32>
    %467 = arith.addf %465, %466 : vector<2x32xf32>
    %468 = vector.extract_strided_slice %462 {offsets = [0, 32], sizes = [2, 32], strides = [1, 1]} : vector<2x128xf32> to vector<2x32xf32>
    %cst_142 = arith.constant 5.000000e-01 : f32
    %469 = vector.broadcast %cst_142 : f32 to vector<2x32xf32>
    %470 = arith.mulf %469, %468 : vector<2x32xf32>
    %cst_143 = arith.constant 5.000000e-01 : f32
    %471 = vector.broadcast %cst_143 : f32 to vector<2x32xf32>
    %472 = arith.addf %470, %471 : vector<2x32xf32>
    %473 = vector.extract_strided_slice %462 {offsets = [0, 64], sizes = [2, 32], strides = [1, 1]} : vector<2x128xf32> to vector<2x32xf32>
    %474 = vector.extract_strided_slice %462 {offsets = [0, 96], sizes = [2, 32], strides = [1, 1]} : vector<2x128xf32> to vector<2x32xf32>
    %cst_144 = arith.constant 5.000000e-01 : f32
    %475 = vector.broadcast %cst_144 : f32 to vector<2x32xf32>
    %476 = arith.mulf %475, %474 : vector<2x32xf32>
    %cst_145 = arith.constant 5.000000e-01 : f32
    %477 = vector.broadcast %cst_145 : f32 to vector<2x32xf32>
    %478 = arith.addf %476, %477 : vector<2x32xf32>
    %479 = arith.mulf %472, %453 : vector<2x32xf32>
    %480 = arith.mulf %467, %473 : vector<2x32xf32>
    %481 = arith.addf %479, %480 : vector<2x32xf32>
    %482 = math.tanh %481 : vector<2x32xf32>
    %483 = arith.mulf %478, %482 : vector<2x32xf32>
    %484 = vector.extract_strided_slice %285 {offsets = [7, 0, 0], sizes = [1, 2, 128], strides = [1, 1, 1]} : vector<8x2x128xf32> to vector<1x2x128xf32>
    %485 = vector.shape_cast %484 : vector<1x2x128xf32> to vector<2x128xf32>
    %486 = arith.truncf %483 : vector<2x32xf32> to vector<2x32xbf16>
    %cst_146 = arith.constant dense<0.000000e+00> : vector<2x128xf32>
    %487 = tpu.matmul %486, %280, %cst_146 {dimension_numbers = #tpu.dot_dimension_numbers<[1], [0], [0], [1], [0, 0, 1, 1], [], []>} : vector<2x32xbf16>, vector<32x128xbf16>, vector<2x128xf32> -> vector<2x128xf32>
    %488 = arith.addf %485, %487 : vector<2x128xf32>
    %489 = arith.mulf %488, %8 : vector<2x128xf32>
    %490 = math.tanh %489 : vector<2x128xf32>
    %491 = vector.extract_strided_slice %490 {offsets = [0, 0], sizes = [2, 32], strides = [1, 1]} : vector<2x128xf32> to vector<2x32xf32>
    %cst_147 = arith.constant 5.000000e-01 : f32
    %492 = vector.broadcast %cst_147 : f32 to vector<2x32xf32>
    %493 = arith.mulf %492, %491 : vector<2x32xf32>
    %cst_148 = arith.constant 5.000000e-01 : f32
    %494 = vector.broadcast %cst_148 : f32 to vector<2x32xf32>
    %495 = arith.addf %493, %494 : vector<2x32xf32>
    %496 = vector.extract_strided_slice %490 {offsets = [0, 32], sizes = [2, 32], strides = [1, 1]} : vector<2x128xf32> to vector<2x32xf32>
    %cst_149 = arith.constant 5.000000e-01 : f32
    %497 = vector.broadcast %cst_149 : f32 to vector<2x32xf32>
    %498 = arith.mulf %497, %496 : vector<2x32xf32>
    %cst_150 = arith.constant 5.000000e-01 : f32
    %499 = vector.broadcast %cst_150 : f32 to vector<2x32xf32>
    %500 = arith.addf %498, %499 : vector<2x32xf32>
    %501 = vector.extract_strided_slice %490 {offsets = [0, 64], sizes = [2, 32], strides = [1, 1]} : vector<2x128xf32> to vector<2x32xf32>
    %502 = vector.extract_strided_slice %490 {offsets = [0, 96], sizes = [2, 32], strides = [1, 1]} : vector<2x128xf32> to vector<2x32xf32>
    %cst_151 = arith.constant 5.000000e-01 : f32
    %503 = vector.broadcast %cst_151 : f32 to vector<2x32xf32>
    %504 = arith.mulf %503, %502 : vector<2x32xf32>
    %cst_152 = arith.constant 5.000000e-01 : f32
    %505 = vector.broadcast %cst_152 : f32 to vector<2x32xf32>
    %506 = arith.addf %504, %505 : vector<2x32xf32>
    %507 = arith.mulf %500, %481 : vector<2x32xf32>
    %508 = arith.mulf %495, %501 : vector<2x32xf32>
    %509 = arith.addf %507, %508 : vector<2x32xf32>
    %510 = math.tanh %509 : vector<2x32xf32>
    %511 = arith.mulf %506, %510 : vector<2x32xf32>
    %c0_153 = arith.constant 0 : index
    %c0_154 = arith.constant 0 : index
    %512 = vector.load %arg7[%c0_153, %c0_154] : memref<32x4xbf16, #tpu.memory_space<vmem>>, vector<32x4xbf16>
    %513 = arith.truncf %511 : vector<2x32xf32> to vector<2x32xbf16>
    %cst_155 = arith.constant dense<0.000000e+00> : vector<2x4xf32>
    %514 = tpu.matmul %513, %512, %cst_155 {dimension_numbers = #tpu.dot_dimension_numbers<[1], [0], [0], [1], [0, 0, 1, 1], [], []>} : vector<2x32xbf16>, vector<32x4xbf16>, vector<2x4xf32> -> vector<2x4xf32>
    %c0_156 = arith.constant 0 : index
    %c0_157 = arith.constant 0 : index
    %515 = vector.load %arg8[%c0_156, %c0_157] : memref<1x4xf32, #tpu.memory_space<vmem>>, vector<1x4xf32>
    %516 = vector.broadcast %515 : vector<1x4xf32> to vector<2x4xf32>
    %517 = arith.addf %514, %516 : vector<2x4xf32>
    %c0_158 = arith.constant 0 : index
    %c0_159 = arith.constant 0 : index
    %518 = vector.load %arg9[%c0_158, %c0_159] : memref<2x4xf32, #tpu.memory_space<vmem>>, vector<2x4xf32>
    tpu.vector_store %arg9[%c0_158, %c0_159], %517 {strides = array<i32>} : memref<2x4xf32, #tpu.memory_space<vmem>>, vector<2x4xf32>,
    return
  }
}

</mosaic_0001>

<bundles_post_ra>
// kernel: lstm_forward.1
= control target key start
LH: loop header
LB: loop body
LE: loop exit
PB: predicated region body
PF: predicated region fallthrough
CT: control target
= control target key end

     0   :  { %vm92_vm0 = vcmask 1041408   ;;  %s1509_s0 = inlined_call_operand.vmem [shape: f32[8,2,4], index: 0, kind: input, shape index: {}]   ;;  %s1510_s1 = inlined_call_operand.vmem [shape: bf16[4,128], index: 1, kind: input, shape index: {}]   ;;  %s1511_s2 = inlined_call_operand.vmem [shape: bf16[32,128], index: 2, kind: input, shape index: {}]   ;;  %s1512_s3 = inlined_call_operand.vmem [shape: f32[1,128], index: 3, kind: input, shape index: {}]   ;;  %s1513_s4 = inlined_call_operand.vmem [shape: bf16[32,128], index: 4, kind: input, shape index: {}]   ;;  %s1514_s5 = inlined_call_operand.vmem [shape: bf16[32,128], index: 5, kind: input, shape index: {}]   ;;  %s1515_s6 = inlined_call_operand.vmem [shape: f32[1,128], index: 6, kind: input, shape index: {}]   ;;  %s1516_s7 = inlined_call_operand.vmem [shape: bf16[32,4], index: 7, kind: input, shape index: {}]   ;;  %s1517_s8 = inlined_call_operand.vmem [shape: f32[1,4], index: 8, kind: input, shape index: {}]   ;;  %s1518_s9 = inlined_call_operand.hbm [shape: f32[2,4], index: 9, kind: output, shape index: {}]  }
   0x1   :  { %v1101_v0 = vld [vmem:[%s1511_s2 + $0x8] sm:$0xff]  ;;  %v56_v1 = vld [vmem:[%s1510_s1] sm:$0x3]  ;;  %v41_v5 = vld [vmem:[%s1509_s0 + $0x2] sm:$0x3] }
   0x2   :  { %v1100_v2 = vld [vmem:[%s1511_s2] sm:$0xff]  ;;  %v94_v3 = vsel %vm92_vm0, %v56_v1, 0  ;;  %146 = vmatpush.bf16.msra.mxu1 %v1101_v0  ;;  %v44_v8 = vld [vmem:[%s1509_s0 + $0x8] sm:$0x3]  ;;  %v49_v10 = vpack.c.bf16 %v41_v5, %v41_v5  ;;  %v45_v11 = vld [vmem:[%s1509_s0 + $0xa] sm:$0x3]  ;;  %201 = vmatpush.bf16.msra.mxu2 %v1101_v0 }
   0x3   :  { %v40_v4 = vld [vmem:[%s1509_s0] sm:$0x3]  ;;  %103 = vmatpush.bf16.msra.mxu0 %v94_v3  ;;  %v42_v6 = vld [vmem:[%s1509_s0 + $0x4] sm:$0x3]  ;;  %v43_v7 = vld [vmem:[%s1509_s0 + $0x6] sm:$0x3]  ;;  %255 = vmatpush.bf16.msra.mxu3 %v1101_v0  ;;  %v52_v16 = vpack.c.bf16 %v44_v8, %v44_v8  ;;  %v53_v17 = vpack.c.bf16 %v45_v11, %v45_v11 }
   0x4   :  { %v48_v9 = vpack.c.bf16 %v40_v4, %v40_v4  ;;  %v46_v12 = vld [vmem:[%s1509_s0 + $0xc] sm:$0x3]  ;;  %v47_v13 = vld [vmem:[%s1509_s0 + $0xe] sm:$0x3]  ;;  %v50_v14 = vpack.c.bf16 %v42_v6, %v42_v6  ;;  %v51_v15 = vpack.c.bf16 %v43_v7, %v43_v7  ;;  %69 = vst [vmem:[#allocation1 + $0x1] ss:$9 sm:$0xff] %v49_v10 }
   0x6   :  { %66 = vst [vmem:[#allocation1] ss:$9 sm:$0xff] %v48_v9 }
   0x7   :  { %309 = vmatpush.bf16.msrb.mxu0 %v1101_v0 }
   0x8   :  { %14 = vsyncpa [#allocation4], 0  ;;  %147 = vmatpush.bf16.msra.mxu1 %v1100_v2  ;;  %v54_v18 = vpack.c.bf16 %v46_v12, %v46_v12  ;;  %72 = vst [vmem:[#allocation1 + $0x2] ss:$9 sm:$0xff] %v50_v14  ;;  %v55_v19 = vpack.c.bf16 %v47_v13, %v47_v13  ;;  %202 = vmatpush.bf16.msra.mxu2 %v1100_v2  ;;  %v1206_v20 = vmov 0   ;;  %vm89_vm1 = vcmask 31744  }
   0x9   :  { %75 = vst [vmem:[#allocation1 + $0x3] ss:$9 sm:$0xff] %v51_v15  ;;  %256 = vmatpush.bf16.msra.mxu3 %v1100_v2  ;;  %v34_v22 = vlaneseq  ;;  %v1298_v25 = vld [vmem:[%s1512_s3] ss:$0 sm:$0xff]  ;;  %v1207_v29 = vmov 0.5   ;;  %s1208_s30 = smov 64  }
   0xa   :  { %78 = vst [vmem:[#allocation1 + $0x4] ss:$9 sm:$0xff] %v52_v16  ;;  %s1209_s3 = smov 32   ;;  %vm136_vm5 = vcmask 261120   ;;  %vm178_vm6 = vcmask 1040384   ;;  %vm186_vm7 = vcmask 253952  }
   0xb   :  { %310 = vmatpush.bf16.msrb.mxu0 %v1100_v2  ;;  %148 = vmatmul.bf16.vlgmr.msra.gmra.mxu1 %v1206_v20  ;;  %81 = vst [vmem:[#allocation1 + $0x5] ss:$9 sm:$0xff] %v53_v17  ;;  %v35_v24 = vand.u32 127, %v34_v22  ;;  %s1210_s2 = smov [#allocation3]   ;;  %s1042_s25 = sshll.u32 %s1518_s9, 4  ;;  %vm1033_vm8 = vcmask 25600   ;;  %s1043_s25 = int_to_ptr.hbm [resolvable:$true] %s1042_s25 }
   0xc   :  { %363 = vmatpush.bf16.msrb.mxu1 %v1101_v0  ;;  %417 = vmatpush.bf16.msrb.mxu2 %v1101_v0  ;;  %84 = vst [vmem:[#allocation1 + $0x6] ss:$9 sm:$0xff] %v54_v18  ;;  %s1040_s22 = sshll.u32 %s1210_s2, 4  ;;  %s1041_s22 = int_to_ptr.vmem [resolvable:$true] %s1040_s22 }
   0xd   :  { %471 = vmatpush.bf16.msrb.mxu3 %v1101_v0  ;;  %87 = vst [vmem:[#allocation1 + $0x7] ss:$9 sm:$0xff] %v55_v19  ;;  %vm36_vm2 = vcmp.ge.s32.totalorder %v35_v24, 64  ;;  %vm37_vm3 = vcmp.lt.s32.totalorder %v35_v24, 96 }
   0xe   :  { %vm38_vm4 = vmand %vm36_vm2, %vm37_vm3 }
   0xf   :  { %v1303_v30 = vsel %vm38_vm4, 1.0, %v1207_v29 }
  0x10   :  { %364 = vmatpush.bf16.msrb.mxu1 %v1100_v2  ;;  %418 = vmatpush.bf16.msrb.mxu2 %v1100_v2 }
  0x11   :  { %472 = vmatpush.bf16.msrb.mxu3 %v1100_v2 }
  0x14   :  { %v88_v21 = vld [vmem:[#allocation1] sm:$0xff] }
  0x15   :  { %1051 = vmatmul.msk.bf16.vlgmr.msra.gmra.mxu0 %vm89_vm1, %v88_v21 }
  0x16   :  { %525 = vmatpush.bf16.msra.mxu0 %v1101_v0 }
  0x1a   :  { %526 = vmatpush.bf16.msra.mxu0 %v1100_v2 }
  0x88   :  { %v149_v23 = vpop.f32.mrf.mxu1 }
  0x90   :  { %v151_v26 = vpop.f32.mrf.mxu1 }
  0x92   :  { %v105_v27 = vpop.f32.mrf.mxu0 }
  0x93   :  { %v1301_v28 = vadd.f32 %v1298_v25, %v105_v27 }
  0x95   :  { %v153_v31 = vadd.f32 %v149_v23, %v1301_v28  ;;  %v112_v48 = vrot.slane %v1301_v28, 2  ;;  %v113_v4 = vrot.slane %v1301_v28, 4  ;;  %v114_v27 = vrot.slane %v1301_v28, 6 }
  0x97   :  { %v154_v32 = vmul.f32 %v153_v31, %v1303_v30 }
  0x99   :  { %1116 = vtanh.f32 %v154_v32 }
  0x9a   :  { %v107_v26 = vpop.f32.mrf.mxu0 }
  0x9f   :  { %v1117_v33 = vpop.eup %1116 }
  0xa0   :  { %160 = vrot.lane.b32.xlu0 %v1117_v33, %s1208_s30  ;;  %v156_v34 = vmul.f32 0.5, %v1117_v33 }
  0xa2   :  { %v157_v35 = vadd.f32 0.5, %v156_v34 }
  0xa4   :  { %v158_v38 = vmul.f32 0.0, %v157_v35 }
 0x112   :  { %v161_v36 = vpop.permute.xlu0 %160 }
 0x113   :  { %v163_v37 = vmul.f32 %v161_v36, %v157_v35 }
 0x115   :  { %165 = vrot.lane.b32.xlu0 %v163_v37, %s1209_s3 }
 0x187   :  { %v166_v39 = vpop.permute.xlu0 %165 }
 0x188   :  { %v168_v40 = vadd.f32 %v166_v39, %v158_v38 }
 0x18a   :  { %1118 = vtanh.f32 %v168_v40 }
 0x190   :  { %v1119_v41 = vpop.eup %1118 }
 0x191   :  { %171 = vrot.lane.b32.xlu1 %v1119_v41, %s1208_s30 }
 0x203   :  { %v172_v42 = vpop.permute.xlu1 %171 }
 0x204   :  { %v174_v43 = vmul.f32 %v172_v42, %v157_v35 }
 0x206   :  { %v1310_v44 = vpack.c.bf16 %v174_v43, %v174_v43 }
 0x208   :  { %v188_v45 = vunpack.c.l.b16 %v1310_v44 }
 0x20a   :  { %v189_v46 = vpack.c.b16 %v188_v45, %v188_v45 }
 0x20c   :  { %190 = vrot.lane.b32.xlu1 %v189_v46, %s1209_s3 }
 0x27e   :  { %v191_v47 = vpop.permute.xlu1 %190 }
 0x27f   :  { %1060 = vmatmul.msk.bf16.vlgmr.msra.gmra.mxu2 %vm136_vm5, %v191_v47 }
 0x302   :  { %v204_v49 = vpop.f32.mrf.mxu2 }
 0x303   :  { %v208_v50 = vadd.f32 %v204_v49, %v112_v48  ;;  %v1346_v49 = vadd.f32 %v1298_v25, %v107_v26 }
 0x305   :  { %v209_v51 = vmul.f32 %v208_v50, %v1303_v30 }
 0x307   :  { %1120 = vtanh.f32 %v209_v51 }
 0x30a   :  { %v206_v52 = vpop.f32.mrf.mxu2 }
 0x30d   :  { %v1121_v53 = vpop.eup %1120 }
 0x30e   :  { %215 = vrot.lane.b32.xlu2 %v1121_v53, %s1208_s30  ;;  %v211_v54 = vmul.f32 0.5, %v1121_v53 }
 0x310   :  { %v212_v55 = vadd.f32 0.5, %v211_v54 }
 0x312   :  { %v213_v58 = vmul.f32 %v212_v55, %v168_v40 }
 0x368   :  { %v216_v56 = vpop.permute.xlu2 %215 }
 0x369   :  { %v218_v57 = vmul.f32 %v216_v56, %v212_v55 }
 0x36b   :  { %220 = vrot.lane.b32.xlu2 %v218_v57, %s1209_s3 }
 0x3c5   :  { %v221_v59 = vpop.permute.xlu2 %220 }
 0x3c6   :  { %v223_v60 = vadd.f32 %v221_v59, %v213_v58 }
 0x3c8   :  { %1122 = vtanh.f32 %v223_v60 }
 0x3ce   :  { %v1123_v61 = vpop.eup %1122 }
 0x3cf   :  { %226 = vrot.lane.b32.xlu0 %v1123_v61, %s1208_s30 }
 0x441   :  { %v227_v62 = vpop.permute.xlu0 %226 }
 0x442   :  { %v229_v63 = vmul.f32 %v227_v62, %v212_v55 }
 0x444   :  { %v1320_v0 = vpack.c.bf16 %v229_v63, %v229_v63 }
 0x446   :  { %v242_v1 = vunpack.c.l.b16 %v1320_v0 }
 0x448   :  { %v243_v2 = vpack.c.b16 %v242_v1, %v242_v1 }
 0x44a   :  { %244 = vrot.lane.b32.xlu1 %v243_v2, %s1209_s3 }
 0x4bc   :  { %v245_v3 = vpop.permute.xlu1 %244 }
 0x4bd   :  { %1061 = vmatmul.msk.bf16.vlgmr.msra.gmra.mxu3 %vm136_vm5, %v245_v3 }
 0x540   :  { %v258_v5 = vpop.f32.mrf.mxu3 }
 0x541   :  { %v262_v6 = vadd.f32 %v258_v5, %v113_v4  ;;  %v115_v5 = vrot.slane %v1346_v49, 2 }
 0x543   :  { %v263_v7 = vmul.f32 %v262_v6, %v1303_v30 }
 0x545   :  { %1124 = vtanh.f32 %v263_v7 }
 0x548   :  { %v260_v8 = vpop.f32.mrf.mxu3 }
 0x54b   :  { %v1125_v9 = vpop.eup %1124 }
 0x54c   :  { %269 = vrot.lane.b32.xlu2 %v1125_v9, %s1208_s30  ;;  %v265_v10 = vmul.f32 0.5, %v1125_v9 }
 0x54e   :  { %v266_v11 = vadd.f32 0.5, %v265_v10 }
 0x550   :  { %v267_v14 = vmul.f32 %v266_v11, %v223_v60 }
 0x5a6   :  { %v270_v12 = vpop.permute.xlu2 %269 }
 0x5a7   :  { %v272_v13 = vmul.f32 %v270_v12, %v266_v11 }
 0x5a9   :  { %274 = vrot.lane.b32.xlu0 %v272_v13, %s1209_s3 }
 0x61b   :  { %v275_v15 = vpop.permute.xlu0 %274 }
 0x61c   :  { %v277_v16 = vadd.f32 %v275_v15, %v267_v14 }
 0x61e   :  { %1126 = vtanh.f32 %v277_v16 }
 0x624   :  { %v1127_v17 = vpop.eup %1126 }
 0x625   :  { %280 = vrot.lane.b32.xlu1 %v1127_v17, %s1208_s30 }
 0x697   :  { %v281_v18 = vpop.permute.xlu1 %280 }
 0x698   :  { %v283_v19 = vmul.f32 %v281_v18, %v266_v11 }
 0x69a   :  { %v1330_v21 = vpack.c.bf16 %v283_v19, %v283_v19 }
 0x69c   :  { %v296_v22 = vunpack.c.l.b16 %v1330_v21 }
 0x69e   :  { %v297_v23 = vpack.c.b16 %v296_v22, %v296_v22 }
 0x6a0   :  { %298 = vrot.lane.b32.xlu2 %v297_v23, %s1209_s3 }
 0x6fa   :  { %v299_v24 = vpop.permute.xlu2 %298 }
 0x6fb   :  { %1062 = vmatmul.msk.bf16.vlgmr.msrb.gmra.mxu0 %vm136_vm5, %v299_v24 }
 0x778   :  { %v312_v29 = vpop.f32.mrf.mxu0 }
 0x779   :  { %v316_v31 = vadd.f32 %v312_v29, %v114_v27  ;;  %v116_v29 = vrot.slane %v1346_v49, 4 }
 0x77b   :  { %v317_v32 = vmul.f32 %v316_v31, %v1303_v30 }
 0x77d   :  { %1128 = vtanh.f32 %v317_v32 }
 0x780   :  { %v314_v33 = vpop.f32.mrf.mxu0 }
 0x783   :  { %v1129_v34 = vpop.eup %1128 }
 0x784   :  { %323 = vrot.lane.b32.xlu0 %v1129_v34, %s1208_s30  ;;  %v319_v35 = vmul.f32 0.5, %v1129_v34 }
 0x786   :  { %v320_v36 = vadd.f32 0.5, %v319_v35 }
 0x788   :  { %v321_v39 = vmul.f32 %v320_v36, %v277_v16 }
 0x7f6   :  { %v324_v37 = vpop.permute.xlu0 %323 }
 0x7f7   :  { %v326_v38 = vmul.f32 %v324_v37, %v320_v36 }
 0x7f9   :  { %328 = vrot.lane.b32.xlu1 %v326_v38, %s1209_s3 }
 0x86b   :  { %v329_v40 = vpop.permute.xlu1 %328 }
 0x86c   :  { %v331_v41 = vadd.f32 %v329_v40, %v321_v39 }
 0x86e   :  { %1130 = vtanh.f32 %v331_v41 }
 0x874   :  { %v1131_v28 = vpop.eup %1130 }
 0x875   :  { %334 = vrot.lane.b32.xlu2 %v1131_v28, %s1208_s30 }
 0x8cf   :  { %v335_v42 = vpop.permute.xlu2 %334 }
 0x8d0   :  { %v337_v43 = vmul.f32 %v335_v42, %v320_v36 }
 0x8d2   :  { %v1340_v45 = vpack.c.bf16 %v337_v43, %v337_v43 }
 0x8d4   :  { %v350_v46 = vunpack.c.l.b16 %v1340_v45 }
 0x8d6   :  { %v351_v47 = vpack.c.b16 %v350_v46, %v350_v46 }
 0x8d8   :  { %352 = vrot.lane.b32.xlu0 %v351_v47, %s1209_s3 }
 0x94a   :  { %v353_v48 = vpop.permute.xlu0 %352 }
 0x94b   :  { %1063 = vmatmul.msk.bf16.vlgmr.msrb.gmra.mxu1 %vm136_vm5, %v353_v48 }
 0x9c8   :  { %v366_v50 = vpop.f32.mrf.mxu1 }
 0x9c9   :  { %v370_v51 = vadd.f32 %v366_v50, %v1346_v49 }
 0x9cb   :  { %v371_v52 = vmul.f32 %v370_v51, %v1303_v30 }
 0x9cd   :  { %1132 = vtanh.f32 %v371_v52  ;;  %v117_v52 = vrot.slane %v1346_v49, 6 }
 0x9d0   :  { %v368_v53 = vpop.f32.mrf.mxu1 }
 0x9d3   :  { %v1133_v54 = vpop.eup %1132 }
 0x9d4   :  { %377 = vrot.lane.b32.xlu1 %v1133_v54, %s1208_s30  ;;  %v373_v55 = vmul.f32 0.5, %v1133_v54 }
 0x9d6   :  { %v374_v56 = vadd.f32 0.5, %v373_v55 }
 0x9d8   :  { %v375_v59 = vmul.f32 %v374_v56, %v331_v41 }
 0xa46   :  { %v378_v57 = vpop.permute.xlu1 %377 }
 0xa47   :  { %v380_v58 = vmul.f32 %v378_v57, %v374_v56 }
 0xa49   :  { %382 = vrot.lane.b32.xlu2 %v380_v58, %s1209_s3  ;;  %v177_v58 = vrot.slane %v1310_v44, 3 }
 0xaa3   :  { %v383_v60 = vpop.permute.xlu2 %382 }
 0xaa4   :  { %v385_v25 = vadd.f32 %v383_v60, %v375_v59  ;;  %v181_v59 = vsel %vm178_vm6, %v1310_v44, %v177_v58  ;;  %v340_v60 = vrot.slane %v1340_v45, 3  ;;  %v232_v44 = vrot.slane %v1320_v0, 3 }
 0xaa6   :  { %1134 = vtanh.f32 %v385_v25  ;;  %v343_v49 = vsel %vm178_vm6, %v1340_v45, %v340_v60  ;;  %v235_v45 = vsel %vm178_vm6, %v1320_v0, %v232_v44 }
 0xaac   :  { %v1135_v61 = vpop.eup %1134 }
 0xaad   :  { %388 = vrot.lane.b32.xlu0 %v1135_v61, %s1208_s30 }
 0xb1f   :  { %v389_v62 = vpop.permute.xlu0 %388 }
 0xb20   :  { %v391_v63 = vmul.f32 %v389_v62, %v374_v56 }
 0xb22   :  { %v1353_v1 = vpack.c.bf16 %v391_v63, %v391_v63 }
 0xb24   :  { %v404_v2 = vunpack.c.l.b16 %v1353_v1 }
 0xb26   :  { %v405_v3 = vpack.c.b16 %v404_v2, %v404_v2 }
 0xb28   :  { %406 = vrot.lane.b32.xlu1 %v405_v3, %s1209_s3 }
 0xb9a   :  { %v407_v4 = vpop.permute.xlu1 %406 }
 0xb9b   :  { %1064 = vmatmul.msk.bf16.vlgmr.msrb.gmra.mxu2 %vm136_vm5, %v407_v4 }
 0xc1e   :  { %v420_v6 = vpop.f32.mrf.mxu2 }
 0xc1f   :  { %v424_v7 = vadd.f32 %v420_v6, %v115_v5  ;;  %v394_v5 = vrot.slane %v1353_v1, 3 }
 0xc21   :  { %v425_v8 = vmul.f32 %v424_v7, %v1303_v30 }
 0xc23   :  { %1136 = vtanh.f32 %v425_v8  ;;  %v397_v8 = vsel %vm178_vm6, %v1353_v1, %v394_v5  ;;  %v286_v1 = vrot.slane %v1330_v21, 3 }
 0xc26   :  { %v422_v9 = vpop.f32.mrf.mxu2 }
 0xc29   :  { %v1137_v10 = vpop.eup %1136 }
 0xc2a   :  { %431 = vrot.lane.b32.xlu2 %v1137_v10, %s1208_s30  ;;  %v427_v11 = vmul.f32 0.5, %v1137_v10 }
 0xc2c   :  { %v428_v12 = vadd.f32 0.5, %v427_v11 }
 0xc2e   :  { %v429_v15 = vmul.f32 %v428_v12, %v385_v25 }
 0xc84   :  { %v432_v13 = vpop.permute.xlu2 %431 }
 0xc85   :  { %v434_v14 = vmul.f32 %v432_v13, %v428_v12 }
 0xc87   :  { %436 = vrot.lane.b32.xlu0 %v434_v14, %s1209_s3 }
 0xcf9   :  { %v437_v16 = vpop.permute.xlu0 %436 }
 0xcfa   :  { %v439_v17 = vadd.f32 %v437_v16, %v429_v15 }
 0xcfc   :  { %1138 = vtanh.f32 %v439_v17 }
 0xd02   :  { %v1139_v18 = vpop.eup %1138 }
 0xd03   :  { %442 = vrot.lane.b32.xlu1 %v1139_v18, %s1208_s30  ;;  %v289_v18 = vsel %vm178_vm6, %v1330_v21, %v286_v1 }
 0xd75   :  { %v443_v19 = vpop.permute.xlu1 %442 }
 0xd76   :  { %v445_v22 = vmul.f32 %v443_v19, %v428_v12 }
 0xd78   :  { %v1363_v23 = vpack.c.bf16 %v445_v22, %v445_v22 }
 0xd7a   :  { %v458_v24 = vunpack.c.l.b16 %v1363_v23  ;;  %v448_v19 = vrot.slane %v1363_v23, 3 }
 0xd7c   :  { %v459_v26 = vpack.c.b16 %v458_v24, %v458_v24  ;;  %v451_v24 = vsel %vm178_vm6, %v1363_v23, %v448_v19 }
 0xd7e   :  { %460 = vrot.lane.b32.xlu2 %v459_v26, %s1209_s3  ;;  %v1105_v26 = vld [vmem:[%s1514_s5 + $0x8] sm:$0xff] }
 0xd7f   :  { %670 = vmatpush.bf16.msra.mxu2 %v1105_v26  ;;  %712 = vmatpush.bf16.msra.mxu3 %v1105_v26 }
 0xd80   :  { %754 = vmatpush.bf16.msrb.mxu0 %v1105_v26 }
 0xdd8   :  { %v461_v27 = vpop.permute.xlu2 %460 }
 0xdd9   :  { %1065 = vmatmul.msk.bf16.vlgmr.msrb.gmra.mxu3 %vm136_vm5, %v461_v27 }
 0xe5c   :  { %v474_v31 = vpop.f32.mrf.mxu3 }
 0xe5d   :  { %v478_v32 = vadd.f32 %v474_v31, %v116_v29 }
 0xe5f   :  { %v479_v33 = vmul.f32 %v478_v32, %v1303_v30 }
 0xe61   :  { %1140 = vtanh.f32 %v479_v33 }
 0xe64   :  { %v476_v34 = vpop.f32.mrf.mxu3 }
 0xe67   :  { %v1141_v35 = vpop.eup %1140 }
 0xe68   :  { %485 = vrot.lane.b32.xlu0 %v1141_v35, %s1208_s30  ;;  %v481_v36 = vmul.f32 0.5, %v1141_v35 }
 0xe6a   :  { %v482_v37 = vadd.f32 0.5, %v481_v36  ;;  %v1104_v36 = vld [vmem:[%s1514_s5] sm:$0xff] }
 0xe6b   :  { %671 = vmatpush.bf16.msra.mxu2 %v1104_v36  ;;  %713 = vmatpush.bf16.msra.mxu3 %v1104_v36 }
 0xe6c   :  { %v483_v40 = vmul.f32 %v482_v37, %v439_v17  ;;  %755 = vmatpush.bf16.msrb.mxu0 %v1104_v36 }
 0xe6e   :  { %672 = vmatmul.bf16.vlgmr.msra.gmra.mxu2 %v1206_v20 }
 0xe6f   :  { %838 = vmatpush.bf16.msrb.mxu2 %v1105_v26  ;;  %880 = vmatpush.bf16.msrb.mxu3 %v1105_v26 }
 0xe73   :  { %839 = vmatpush.bf16.msrb.mxu2 %v1104_v36  ;;  %881 = vmatpush.bf16.msrb.mxu3 %v1104_v36 }
 0xeda   :  { %v486_v38 = vpop.permute.xlu0 %485 }
 0xedb   :  { %v488_v39 = vmul.f32 %v486_v38, %v482_v37  ;;  %v1102_v38 = vld [vmem:[%s1513_s4] sm:$0xff] }
 0xedd   :  { %490 = vrot.lane.b32.xlu1 %v488_v39, %s1209_s3 }
 0xf4f   :  { %v491_v41 = vpop.permute.xlu1 %490 }
 0xf50   :  { %v493_v28 = vadd.f32 %v491_v41, %v483_v40  ;;  %v673_v41 = vpop.f32.mrf.mxu2 }
 0xf52   :  { %1142 = vtanh.f32 %v493_v28 }
 0xf58   :  { %v1143_v42 = vpop.eup %1142 }
 0xf59   :  { %496 = vrot.lane.b32.xlu2 %v1143_v42, %s1208_s30  ;;  %v1433_v42 = vld [vmem:[%s1515_s6] ss:$0 sm:$0xff] }
 0xfb3   :  { %v497_v43 = vpop.permute.xlu2 %496 }
 0xfb4   :  { %v499_v46 = vmul.f32 %v497_v43, %v482_v37  ;;  %v1103_v37 = vld [vmem:[%s1513_s4 + $0x8] sm:$0xff] }
 0xfb5   :  { %630 = vmatpush.bf16.msra.mxu1 %v1103_v37 }
 0xfb6   :  { %v500_v47 = vpack.c.bf16 %v499_v46, %v499_v46 }
 0xfb8   :  { %v512_v48 = vunpack.c.l.b16 %v500_v47  ;;  %v502_v25 = vrot.slane %v500_v47, 3 }
 0xfb9   :  { %631 = vmatpush.bf16.msra.mxu1 %v1102_v38 }
 0xfba   :  { %v513_v50 = vpack.c.b16 %v512_v48, %v512_v48  ;;  %v505_v61 = vsel %vm178_vm6, %v500_v47, %v502_v25 }
 0xfbc   :  { %514 = vrot.lane.b32.xlu0 %v513_v50, %s1209_s3 }
 0xfbd   :  { %796 = vmatpush.bf16.msrb.mxu1 %v1105_v26 }
 0xfc1   :  { %797 = vmatpush.bf16.msrb.mxu1 %v1104_v36 }
0x102e   :  { %v515_v51 = vpop.permute.xlu0 %514 }
0x102f   :  { %1066 = vmatmul.msk.bf16.vlgmr.msra.gmra.mxu0 %vm136_vm5, %v515_v51 }
0x1030   :  { %922 = vmatpush.bf16.msra.mxu0 %v1105_v26 }
0x1034   :  { %923 = vmatpush.bf16.msra.mxu0 %v1104_v36 }
0x10ac   :  { %v528_v53 = vpop.f32.mrf.mxu0 }
0x10ad   :  { %v532_v54 = vadd.f32 %v528_v53, %v117_v52 }
0x10af   :  { %v533_v55 = vmul.f32 %v532_v54, %v1303_v30 }
0x10b1   :  { %1144 = vtanh.f32 %v533_v55 }
0x10b4   :  { %v530_v56 = vpop.f32.mrf.mxu0 }
0x10b7   :  { %v1145_v57 = vpop.eup %1144 }
0x10b8   :  { %539 = vrot.lane.b32.xlu1 %v1145_v57, %s1208_s30  ;;  %v535_v62 = vmul.f32 0.5, %v1145_v57 }
0x10ba   :  { %v536_v63 = vadd.f32 0.5, %v535_v62 }
0x10bc   :  { %v537_v11 = vmul.f32 %v536_v63, %v493_v28  ;;  %v675_v28 = vpop.f32.mrf.mxu2 }
0x10c0   :  { %183 = vrot.lane.b32.xlu1 %v181_v59, %s1209_s3 }
0x10c8   :  { %345 = vrot.lane.b32.xlu1 %v343_v49, %s1209_s3 }
0x10d0   :  { %507 = vrot.lane.b32.xlu1 %v505_v61, %s1209_s3 }
0x112a   :  { %v540_v2 = vpop.permute.xlu1 %539 }
0x112b   :  { %v542_v3 = vmul.f32 %v540_v2, %v536_v63 }
0x112d   :  { %544 = vrot.lane.b32.xlu2 %v542_v3, %s1209_s3 }
0x1132   :  { %v184_v4 = vpop.permute.xlu1 %183 }
0x1133   :  { %187 = vst.msk [vmem:[#allocation2] sm:$0x1] %vm186_vm7, %v184_v4 }
0x1135   :  { %237 = vrot.lane.b32.xlu2 %v235_v45, %s1209_s3 }
0x113a   :  { %v566_v6 = vld [vmem:[#allocation2] sm:$0x1]  ;;  %v346_v7 = vpop.permute.xlu1 %345 }
0x113b   :  { %587 = vst [vmem:[#allocation1] ss:$9 sm:$0xff] %v566_v6 }
0x113c   :  { %349 = vst.msk [vmem:[#allocation2 + $0x3] sm:$0x1] %vm186_vm7, %v346_v7 }
0x113d   :  { %399 = vrot.lane.b32.xlu2 %v397_v8, %s1209_s3 }
0x1142   :  { %v508_v9 = vpop.permute.xlu1 %507 }
0x1143   :  { %v569_v10 = vld [vmem:[#allocation2 + $0x3] sm:$0x1]  ;;  %511 = vst.msk [vmem:[#allocation2 + $0x6] sm:$0x1] %vm186_vm7, %v508_v9 }
0x1144   :  { %596 = vst [vmem:[#allocation1 + $0x3] ss:$9 sm:$0xff] %v569_v10 }
0x114a   :  { %v572_v0 = vld [vmem:[#allocation2 + $0x6] sm:$0x1] }
0x114b   :  { %605 = vst [vmem:[#allocation1 + $0x6] ss:$9 sm:$0xff] %v572_v0 }
0x1187   :  { %v545_v12 = vpop.permute.xlu2 %544 }
0x1188   :  { %v547_v13 = vadd.f32 %v545_v12, %v537_v11 }
0x118a   :  { %1146 = vtanh.f32 %v547_v13 }
0x118f   :  { %v238_v14 = vpop.permute.xlu2 %237 }
0x1190   :  { %v1147_v15 = vpop.eup %1146  ;;  %241 = vst.msk [vmem:[#allocation2 + $0x1] sm:$0x1] %vm186_vm7, %v238_v14 }
0x1191   :  { %550 = vrot.lane.b32.xlu0 %v1147_v15, %s1208_s30 }
0x1197   :  { %v567_v16 = vld [vmem:[#allocation2 + $0x1] sm:$0x1]  ;;  %v400_v17 = vpop.permute.xlu2 %399 }
0x1198   :  { %590 = vst [vmem:[#allocation1 + $0x1] ss:$9 sm:$0xff] %v567_v16 }
0x1199   :  { %403 = vst.msk [vmem:[#allocation2 + $0x4] sm:$0x1] %vm186_vm7, %v400_v17  ;;  %291 = vrot.lane.b32.xlu0 %v289_v18, %s1209_s3 }
0x11a0   :  { %v570_v22 = vld [vmem:[#allocation2 + $0x4] sm:$0x1] }
0x11a1   :  { %599 = vst [vmem:[#allocation1 + $0x4] ss:$9 sm:$0xff] %v570_v22  ;;  %453 = vrot.lane.b32.xlu0 %v451_v24, %s1209_s3 }
0x1203   :  { %v551_v21 = vpop.permute.xlu0 %550 }
0x1204   :  { %v553_v27 = vmul.f32 %v551_v21, %v536_v63 }
0x1206   :  { %v554_v29 = vpack.c.bf16 %v553_v27, %v553_v27 }
0x1208   :  { %v556_v31 = vrot.slane %v554_v29, 3 }
0x120a   :  { %v559_v32 = vsel %vm178_vm6, %v554_v29, %v556_v31 }
0x120b   :  { %561 = vrot.lane.b32.xlu2 %v559_v32, %s1209_s3  ;;  %v292_v33 = vpop.permute.xlu0 %291 }
0x120c   :  { %295 = vst.msk [vmem:[#allocation2 + $0x2] sm:$0x1] %vm186_vm7, %v292_v33 }
0x1213   :  { %v568_v23 = vld [vmem:[#allocation2 + $0x2] sm:$0x1]  ;;  %v454_v34 = vpop.permute.xlu0 %453 }
0x1214   :  { %593 = vst [vmem:[#allocation1 + $0x2] ss:$9 sm:$0xff] %v568_v23 }
0x1215   :  { %457 = vst.msk [vmem:[#allocation2 + $0x5] sm:$0x1] %vm186_vm7, %v454_v34 }
0x121c   :  { %v571_v35 = vld [vmem:[#allocation2 + $0x5] sm:$0x1] }
0x121d   :  { %602 = vst [vmem:[#allocation1 + $0x5] ss:$9 sm:$0xff] %v571_v35 }
0x1265   :  { %v562_v39 = vpop.permute.xlu2 %561 }
0x1266   :  { %565 = vst.msk [vmem:[#allocation2 + $0x7] sm:$0x1] %vm186_vm7, %v562_v39 }
0x126d   :  { %v573_v40 = vld [vmem:[#allocation2 + $0x7] sm:$0x1] }
0x126e   :  { %608 = vst [vmem:[#allocation1 + $0x7] ss:$9 sm:$0xff] %v573_v40 }
0x1275   :  { %v609_v20 = vld [vmem:[#allocation1] sm:$0xff] }
0x1276   :  { %1075 = vmatmul.msk.bf16.vlgmr.msra.gmra.mxu1 %vm136_vm5, %v609_v20 }
0x1277   :  { %964 = vmatpush.bf16.msra.mxu1 %v1105_v26 }
0x127b   :  { %965 = vmatpush.bf16.msra.mxu1 %v1104_v36 }
0x12f3   :  { %v633_v43 = vpop.f32.mrf.mxu1 }
0x12f4   :  { %v1436_v46 = vadd.f32 %v1433_v42, %v633_v43 }
0x12f6   :  { %v677_v47 = vadd.f32 %v673_v41, %v1436_v46  ;;  %v640_v61 = vrot.slane %v1436_v46, 2  ;;  %v641_v14 = vrot.slane %v1436_v46, 4  ;;  %v642_v36 = vrot.slane %v1436_v46, 6 }
0x12f8   :  { %v678_v48 = vmul.f32 %v677_v47, %v1303_v30 }
0x12fa   :  { %1148 = vtanh.f32 %v678_v48 }
0x12fb   :  { %v635_v35 = vpop.f32.mrf.mxu1 }
0x1300   :  { %v1149_v50 = vpop.eup %1148 }
0x1301   :  { %684 = vrot.lane.b32.xlu0 %v1149_v50, %s1208_s30  ;;  %v680_v51 = vmul.f32 0.5, %v1149_v50 }
0x1303   :  { %v681_v52 = vadd.f32 0.5, %v680_v51 }
0x1305   :  { %v682_v55 = vmul.f32 0.0, %v681_v52 }
0x1373   :  { %v685_v53 = vpop.permute.xlu0 %684 }
0x1374   :  { %v687_v54 = vmul.f32 %v685_v53, %v681_v52 }
0x1376   :  { %689 = vrot.lane.b32.xlu1 %v687_v54, %s1209_s3 }
0x13e8   :  { %v690_v56 = vpop.permute.xlu1 %689 }
0x13e9   :  { %v692_v57 = vadd.f32 %v690_v56, %v682_v55  ;;  %v1467_v56 = vadd.f32 %v1433_v42, %v635_v35 }
0x13eb   :  { %1150 = vtanh.f32 %v692_v57 }
0x13f1   :  { %v1151_v58 = vpop.eup %1150 }
0x13f2   :  { %695 = vrot.lane.b32.xlu2 %v1151_v58, %s1208_s30 }
0x144c   :  { %v696_v59 = vpop.permute.xlu2 %695 }
0x144d   :  { %v698_v60 = vmul.f32 %v696_v59, %v681_v52 }
0x144f   :  { %v699_v49 = vpack.c.bf16 %v698_v60, %v698_v60 }
0x1451   :  { %701 = vrot.lane.b32.xlu0 %v699_v49, %s1209_s3 }
0x14c3   :  { %v702_v25 = vpop.permute.xlu0 %701 }
0x14c4   :  { %1084 = vmatmul.msk.bf16.vlgmr.msra.gmra.mxu3 %vm136_vm5, %v702_v25 }
0x1547   :  { %v715_v62 = vpop.f32.mrf.mxu3 }
0x1548   :  { %v719_v63 = vadd.f32 %v715_v62, %v640_v61 }
0x154a   :  { %v720_v2 = vmul.f32 %v719_v63, %v1303_v30 }
0x154c   :  { %1152 = vtanh.f32 %v720_v2 }
0x154f   :  { %v717_v3 = vpop.f32.mrf.mxu3 }
0x1552   :  { %v1153_v44 = vpop.eup %1152 }
0x1553   :  { %726 = vrot.lane.b32.xlu1 %v1153_v44, %s1208_s30  ;;  %v722_v4 = vmul.f32 0.5, %v1153_v44 }
0x1555   :  { %v723_v45 = vadd.f32 0.5, %v722_v4 }
0x1557   :  { %v724_v7 = vmul.f32 %v723_v45, %v692_v57 }
0x15c5   :  { %v727_v5 = vpop.permute.xlu1 %726 }
0x15c6   :  { %v729_v6 = vmul.f32 %v727_v5, %v723_v45 }
0x15c8   :  { %731 = vrot.lane.b32.xlu2 %v729_v6, %s1209_s3 }
0x1622   :  { %v732_v8 = vpop.permute.xlu2 %731 }
0x1623   :  { %v734_v9 = vadd.f32 %v732_v8, %v724_v7  ;;  %v643_v7 = vrot.slane %v1467_v56, 2 }
0x1625   :  { %1154 = vtanh.f32 %v734_v9 }
0x162b   :  { %v1155_v10 = vpop.eup %1154 }
0x162c   :  { %737 = vrot.lane.b32.xlu0 %v1155_v10, %s1208_s30 }
0x169e   :  { %v738_v0 = vpop.permute.xlu0 %737 }
0x169f   :  { %v740_v11 = vmul.f32 %v738_v0, %v723_v45 }
0x16a1   :  { %v741_v12 = vpack.c.bf16 %v740_v11, %v740_v11 }
0x16a3   :  { %743 = vrot.lane.b32.xlu1 %v741_v12, %s1209_s3 }
0x1715   :  { %v744_v13 = vpop.permute.xlu1 %743 }
0x1716   :  { %1085 = vmatmul.msk.bf16.vlgmr.msrb.gmra.mxu0 %vm136_vm5, %v744_v13 }
0x1793   :  { %v757_v15 = vpop.f32.mrf.mxu0 }
0x1794   :  { %v761_v1 = vadd.f32 %v757_v15, %v641_v14 }
0x1796   :  { %v762_v16 = vmul.f32 %v761_v1, %v1303_v30 }
0x1798   :  { %1156 = vtanh.f32 %v762_v16 }
0x179b   :  { %v759_v17 = vpop.f32.mrf.mxu0 }
0x179e   :  { %v1157_v18 = vpop.eup %1156 }
0x179f   :  { %768 = vrot.lane.b32.xlu2 %v1157_v18, %s1208_s30  ;;  %v764_v19 = vmul.f32 0.5, %v1157_v18 }
0x17a1   :  { %v765_v22 = vadd.f32 0.5, %v764_v19 }
0x17a3   :  { %v766_v21 = vmul.f32 %v765_v22, %v734_v9 }
0x17f9   :  { %v769_v24 = vpop.permute.xlu2 %768 }
0x17fa   :  { %v771_v26 = vmul.f32 %v769_v24, %v765_v22 }
0x17fc   :  { %773 = vrot.lane.b32.xlu0 %v771_v26, %s1209_s3 }
0x186e   :  { %v774_v27 = vpop.permute.xlu0 %773 }
0x186f   :  { %v776_v29 = vadd.f32 %v774_v27, %v766_v21  ;;  %v644_v21 = vrot.slane %v1467_v56, 4 }
0x1871   :  { %1158 = vtanh.f32 %v776_v29 }
0x1877   :  { %v1159_v31 = vpop.eup %1158 }
0x1878   :  { %779 = vrot.lane.b32.xlu1 %v1159_v31, %s1208_s30 }
0x18ea   :  { %v780_v32 = vpop.permute.xlu1 %779 }
0x18eb   :  { %v782_v33 = vmul.f32 %v780_v32, %v765_v22 }
0x18ed   :  { %v783_v23 = vpack.c.bf16 %v782_v33, %v782_v33 }
0x18ef   :  { %785 = vrot.lane.b32.xlu2 %v783_v23, %s1209_s3 }
0x1949   :  { %v786_v34 = vpop.permute.xlu2 %785 }
0x194a   :  { %1086 = vmatmul.msk.bf16.vlgmr.msrb.gmra.mxu1 %vm136_vm5, %v786_v34 }
0x19c7   :  { %v799_v37 = vpop.f32.mrf.mxu1 }
0x19c8   :  { %v803_v38 = vadd.f32 %v799_v37, %v642_v36 }
0x19ca   :  { %v804_v39 = vmul.f32 %v803_v38, %v1303_v30 }
0x19cc   :  { %1160 = vtanh.f32 %v804_v39 }
0x19cf   :  { %v801_v40 = vpop.f32.mrf.mxu1 }
0x19d2   :  { %v1161_v20 = vpop.eup %1160 }
0x19d3   :  { %810 = vrot.lane.b32.xlu0 %v1161_v20, %s1208_s30  ;;  %v806_v41 = vmul.f32 0.5, %v1161_v20 }
0x19d5   :  { %v807_v28 = vadd.f32 0.5, %v806_v41 }
0x19d7   :  { %v808_v48 = vmul.f32 %v807_v28, %v776_v29 }
0x1a45   :  { %v811_v43 = vpop.permute.xlu0 %810 }
0x1a46   :  { %v813_v47 = vmul.f32 %v811_v43, %v807_v28 }
0x1a48   :  { %815 = vrot.lane.b32.xlu1 %v813_v47, %s1209_s3  ;;  %v645_v47 = vrot.slane %v1467_v56, 6 }
0x1aba   :  { %v816_v50 = vpop.permute.xlu1 %815 }
0x1abb   :  { %v818_v51 = vadd.f32 %v816_v50, %v808_v48 }
0x1abd   :  { %1162 = vtanh.f32 %v818_v51 }
0x1ac3   :  { %v1163_v46 = vpop.eup %1162 }
0x1ac4   :  { %821 = vrot.lane.b32.xlu2 %v1163_v46, %s1208_s30 }
0x1b1e   :  { %v822_v52 = vpop.permute.xlu2 %821 }
0x1b1f   :  { %v824_v53 = vmul.f32 %v822_v52, %v807_v28 }
0x1b21   :  { %v825_v54 = vpack.c.bf16 %v824_v53, %v824_v53 }
0x1b23   :  { %827 = vrot.lane.b32.xlu0 %v825_v54, %s1209_s3 }
0x1b95   :  { %v828_v55 = vpop.permute.xlu0 %827 }
0x1b96   :  { %1087 = vmatmul.msk.bf16.vlgmr.msrb.gmra.mxu2 %vm136_vm5, %v828_v55 }
0x1c19   :  { %v841_v57 = vpop.f32.mrf.mxu2 }
0x1c1a   :  { %v845_v58 = vadd.f32 %v841_v57, %v1467_v56 }
0x1c1c   :  { %v846_v59 = vmul.f32 %v845_v58, %v1303_v30 }
0x1c1e   :  { %1164 = vtanh.f32 %v846_v59 }
0x1c21   :  { %v843_v60 = vpop.f32.mrf.mxu2 }
0x1c24   :  { %v1165_v49 = vpop.eup %1164 }
0x1c25   :  { %852 = vrot.lane.b32.xlu1 %v1165_v49, %s1208_s30  ;;  %v848_v25 = vmul.f32 0.5, %v1165_v49  ;;  %v1106_v49 = vld [vmem:[%s1516_s7] sm:$0xff] }
0x1c27   :  { %v849_v61 = vadd.f32 0.5, %v848_v25 }
0x1c29   :  { %v850_v2 = vmul.f32 %v849_v61, %v818_v51 }
0x1c97   :  { %v853_v62 = vpop.permute.xlu1 %852 }
0x1c98   :  { %v855_v63 = vmul.f32 %v853_v62, %v849_v61 }
0x1c9a   :  { %857 = vrot.lane.b32.xlu2 %v855_v63, %s1209_s3 }
0x1cf4   :  { %v858_v3 = vpop.permute.xlu2 %857 }
0x1cf5   :  { %v860_v42 = vadd.f32 %v858_v3, %v850_v2  ;;  %v1115_v2 = vld [vmem:[%s1517_s8] ss:$0 sm:$0xff] }
0x1cf7   :  { %1166 = vtanh.f32 %v860_v42 }
0x1cfd   :  { %v1167_v44 = vpop.eup %1166 }
0x1cfe   :  { %863 = vrot.lane.b32.xlu0 %v1167_v44, %s1208_s30 }
0x1d70   :  { %v864_v4 = vpop.permute.xlu0 %863 }
0x1d71   :  { %v866_v45 = vmul.f32 %v864_v4, %v849_v61 }
0x1d73   :  { %v867_v5 = vpack.c.bf16 %v866_v45, %v866_v45 }
0x1d75   :  { %869 = vrot.lane.b32.xlu1 %v867_v5, %s1209_s3 }
0x1de7   :  { %v870_v6 = vpop.permute.xlu1 %869 }
0x1de8   :  { %1088 = vmatmul.msk.bf16.vlgmr.msrb.gmra.mxu3 %vm136_vm5, %v870_v6 }
0x1e6b   :  { %v883_v8 = vpop.f32.mrf.mxu3 }
0x1e6c   :  { %v887_v9 = vadd.f32 %v883_v8, %v643_v7 }
0x1e6e   :  { %v888_v10 = vmul.f32 %v887_v9, %v1303_v30 }
0x1e70   :  { %1168 = vtanh.f32 %v888_v10 }
0x1e73   :  { %v885_v0 = vpop.f32.mrf.mxu3 }
0x1e76   :  { %v1169_v11 = vpop.eup %1168 }
0x1e77   :  { %894 = vrot.lane.b32.xlu2 %v1169_v11, %s1208_s30  ;;  %v890_v12 = vmul.f32 0.5, %v1169_v11 }
0x1e79   :  { %v891_v13 = vadd.f32 0.5, %v890_v12 }
0x1e7b   :  { %v892_v1 = vmul.f32 %v891_v13, %v860_v42 }
0x1ed1   :  { %v895_v14 = vpop.permute.xlu2 %894 }
0x1ed2   :  { %v897_v15 = vmul.f32 %v895_v14, %v891_v13 }
0x1ed4   :  { %899 = vrot.lane.b32.xlu0 %v897_v15, %s1209_s3 }
0x1f46   :  { %v900_v16 = vpop.permute.xlu0 %899 }
0x1f47   :  { %v902_v17 = vadd.f32 %v900_v16, %v892_v1 }
0x1f49   :  { %1170 = vtanh.f32 %v902_v17 }
0x1f4f   :  { %v1171_v18 = vpop.eup %1170 }
0x1f50   :  { %905 = vrot.lane.b32.xlu1 %v1171_v18, %s1208_s30 }
0x1fc2   :  { %v906_v19 = vpop.permute.xlu1 %905 }
0x1fc3   :  { %v908_v22 = vmul.f32 %v906_v19, %v891_v13 }
0x1fc5   :  { %v909_v24 = vpack.c.bf16 %v908_v22, %v908_v22 }
0x1fc7   :  { %911 = vrot.lane.b32.xlu2 %v909_v24, %s1209_s3 }
0x2021   :  { %v912_v26 = vpop.permute.xlu2 %911 }
0x2022   :  { %1089 = vmatmul.msk.bf16.vlgmr.msra.gmra.mxu0 %vm136_vm5, %v912_v26 }
0x209f   :  { %v925_v27 = vpop.f32.mrf.mxu0 }
0x20a0   :  { %v929_v29 = vadd.f32 %v925_v27, %v644_v21 }
0x20a2   :  { %v930_v31 = vmul.f32 %v929_v29, %v1303_v30 }
0x20a4   :  { %1172 = vtanh.f32 %v930_v31 }
0x20a7   :  { %v927_v32 = vpop.f32.mrf.mxu0 }
0x20aa   :  { %v1173_v33 = vpop.eup %1172 }
0x20ab   :  { %936 = vrot.lane.b32.xlu0 %v1173_v33, %s1208_s30  ;;  %v932_v23 = vmul.f32 0.5, %v1173_v33 }
0x20ad   :  { %v933_v34 = vadd.f32 0.5, %v932_v23 }
0x20af   :  { %v934_v37 = vmul.f32 %v933_v34, %v902_v17 }
0x211d   :  { %v937_v35 = vpop.permute.xlu0 %936 }
0x211e   :  { %v939_v36 = vmul.f32 %v937_v35, %v933_v34 }
0x2120   :  { %941 = vrot.lane.b32.xlu1 %v939_v36, %s1209_s3 }
0x2192   :  { %v942_v38 = vpop.permute.xlu1 %941 }
0x2193   :  { %v944_v39 = vadd.f32 %v942_v38, %v934_v37 }
0x2195   :  { %1174 = vtanh.f32 %v944_v39 }
0x219b   :  { %v1175_v40 = vpop.eup %1174 }
0x219c   :  { %947 = vrot.lane.b32.xlu2 %v1175_v40, %s1208_s30 }
0x21f6   :  { %v948_v20 = vpop.permute.xlu2 %947 }
0x21f7   :  { %v950_v41 = vmul.f32 %v948_v20, %v933_v34 }
0x21f9   :  { %v951_v28 = vpack.c.bf16 %v950_v41, %v950_v41 }
0x21fb   :  { %953 = vrot.lane.b32.xlu0 %v951_v28, %s1209_s3 }
0x226d   :  { %v954_v43 = vpop.permute.xlu0 %953 }
0x226e   :  { %1090 = vmatmul.msk.bf16.vlgmr.msra.gmra.mxu1 %vm136_vm5, %v954_v43 }
0x22eb   :  { %v967_v48 = vpop.f32.mrf.mxu1 }
0x22ec   :  { %v971_v50 = vadd.f32 %v967_v48, %v645_v47 }
0x22ee   :  { %v972_v51 = vmul.f32 %v971_v50, %v1303_v30  ;;  %v1107_v30 = vld [vmem:[%s1516_s7 + $0x8] sm:$0xff] }
0x22ef   :  { %1026 = vmatpush.bf16.msra.mxu2 %v1107_v30 }
0x22f0   :  { %1176 = vtanh.f32 %v972_v51 }
0x22f3   :  { %v969_v46 = vpop.f32.mrf.mxu1  ;;  %1027 = vmatpush.bf16.msra.mxu2 %v1106_v49 }
0x22f6   :  { %v1177_v52 = vpop.eup %1176 }
0x22f7   :  { %978 = vrot.lane.b32.xlu1 %v1177_v52, %s1208_s30  ;;  %v974_v53 = vmul.f32 0.5, %v1177_v52 }
0x22f9   :  { %v975_v54 = vadd.f32 0.5, %v974_v53 }
0x22fb   :  { %v976_v58 = vmul.f32 %v975_v54, %v944_v39 }
0x2369   :  { %v979_v55 = vpop.permute.xlu1 %978 }
0x236a   :  { %v981_v57 = vmul.f32 %v979_v55, %v975_v54 }
0x236c   :  { %983 = vrot.lane.b32.xlu2 %v981_v57, %s1209_s3 }
0x23c6   :  { %v984_v59 = vpop.permute.xlu2 %983 }
0x23c7   :  { %v986_v60 = vadd.f32 %v984_v59, %v976_v58 }
0x23c9   :  { %1178 = vtanh.f32 %v986_v60 }
0x23cf   :  { %v1179_v56 = vpop.eup %1178 }
0x23d0   :  { %989 = vrot.lane.b32.xlu0 %v1179_v56, %s1208_s30 }
0x2442   :  { %v990_v25 = vpop.permute.xlu0 %989 }
0x2443   :  { %v992_v61 = vmul.f32 %v990_v25, %v975_v54 }
0x2445   :  { %v997_v62 = vpack.c.bf16 %v992_v61, %v992_v61 }
0x2447   :  { %1003 = vrot.lane.b32.xlu1 %v997_v62, %s1209_s3 }
0x24b9   :  { %v1004_v63 = vpop.permute.xlu1 %1003 }
0x24ba   :  { %1099 = vmatmul.msk.bf16.vlgmr.msra.gmra.mxu2 %vm136_vm5, %v1004_v63 }
0x253d   :  { %v1029_v3 = vpop.f32.mrf.mxu2 }
0x253e   :  { %v1030_v42 = vadd.f32 %v1115_v2, %v1029_v3 }
0x2540   :  { %1034 = vst.msk [vmem:[#allocation3] sm:$0x3] %vm1033_vm8, %v1030_v42 }
0x2541   :  { %1045 = dma.vmem_to_hbm [thread:$0]  %s1041_s22, 32, %s1043_s25, [#allocation4]  }
0x2545   :  { %v1031_v44 = vpop.f32.mrf.mxu2 }
0x2546   :  { %1204 = dma.done.wait [#allocation4], 32  }
0x2547   :  { %1205 = vsyncadd [#allocation4], 4294967264 }
0x2548   :  { %1050 = vsyncpa [#allocation4], 1 }

</bundles_post_ra>
